<compile_context>
chip_gen: v7x
topology: tpu7x:2x2x1
jax: 0.10.0
libtpu: 0.0.40
codegen_flags: <defaults>
</compile_context>

<pallas_src>
import numpy as np
import jax
import jax.numpy as jnp
from jax.experimental import pallas as pl
from jax.experimental.pallas import tpu as pltpu

EPS = 1e-5
NEG_SLOPE = 0.02
K_PAD = 128  # Linear contraction dim 100 padded to a lane multiple


# ------------------------------ fused kernel ------------------------------- #

def simple_gen_kernel(x_ref, w1_ref, g1_ref, be1_ref,
                      m1_ref, g2_ref, be2_ref, m2_ref, bc2_ref,
                      o_ref):
    B = x_ref.shape[0]

    # ---- Linear(100,1024) + BatchNorm1d + LeakyReLU (batch stats, axis 0) ----
    # Linear bias omitted: BN1 subtracts the per-feature batch mean, which
    # cancels any per-feature constant exactly.
    h1 = jnp.dot(x_ref[...].astype(jnp.bfloat16), w1_ref[...],
                 preferred_element_type=jnp.float32)                 # (B,1024)
    mu1 = jnp.mean(h1, axis=0, keepdims=True)
    c1 = h1 - mu1
    var1 = jnp.mean(c1 * c1, axis=0, keepdims=True)
    z1 = c1 * (jax.lax.rsqrt(var1 + EPS) * g1_ref[...]) + be1_ref[...]
    a1 = jnp.where(z1 >= 0.0, z1, NEG_SLOPE * z1)                    # (B,1024)

    # ---- Reshape(256,2,2) + ConvT2d(256->128,k3,s1,p1) as one matmul ----
    # m1 rows follow the Reshape layout (ic*4 + spatial); columns are
    # (spatial 2x2)*128 + out_channel, so channels sit on lanes.
    # conv1 bias omitted: BN2 subtracts the per-channel batch mean, which
    # cancels the per-channel constant exactly.
    h2 = jnp.dot(a1.astype(jnp.bfloat16), m1_ref[...],
                 preferred_element_type=jnp.float32)                 # (B,512)

    # ---- BatchNorm2d(128) stats on the pre-upsample tensor ----
    # (nearest x2 replication leaves per-channel mean / biased var unchanged)
    s = [h2[:, i * 128:(i + 1) * 128] for i in range(4)]             # 4 x (B,128)
    inv_n = 1.0 / (4.0 * B)
    mu2 = jnp.sum(s[0] + s[1] + s[2] + s[3], axis=0, keepdims=True) * inv_n
    c = [si - mu2 for si in s]
    var2 = jnp.sum(c[0] * c[0] + c[1] * c[1] + c[2] * c[2] + c[3] * c[3],
                   axis=0, keepdims=True) * inv_n
    scale2 = jax.lax.rsqrt(var2 + EPS) * g2_ref[...]                 # (1,128)

    # ---- BN affine + LeakyReLU + (Upsample folded in) ConvT2d(128->1) + ReLU ----
    out = bc2_ref[...]                                               # (1,36)
    for i in range(4):
        z2 = c[i] * scale2 + be2_ref[...]
        a2 = jnp.where(z2 >= 0.0, z2, NEG_SLOPE * z2)
        out = out + jnp.dot(a2.astype(jnp.bfloat16),
                            m2_ref[i * 128:(i + 1) * 128, :],
                            preferred_element_type=jnp.float32)      # (B,36)
    o_ref[...] = jnp.maximum(out, 0.0)


# --------------------- host-side weight preprocessing ----------------------- #

def _build_conv1_matrix(wct1):
    """ConvTranspose2d(256,128,3,1,1) on a 2x2 map as a (1024, 512) matrix.

    rows: ic*4 + (ii*2+jj)  (matches torch Reshape(256,2,2) flattening)
    cols: (oi*2+oj)*128 + oc  (spatial-major, channels on lanes)
    """
    w = np.asarray(wct1, np.float32)                      # (256, 128, 3, 3)
    m = np.zeros((256 * 4, 4 * 128), np.float32)
    for ii in range(2):
        for jj in range(2):
            for oi in range(2):
                for oj in range(2):
                    ki, kj = oi - ii + 1, oj - jj + 1     # padding = 1
                    if 0 <= ki < 3 and 0 <= kj < 3:
                        m[(ii * 2 + jj)::4,
                          (oi * 2 + oj) * 128:(oi * 2 + oj + 1) * 128] = w[:, :, ki, kj]
    return m


def _build_conv2_matrix(wct2):
    """Upsample(x2 nearest) + ConvTranspose2d(128,1,3,1,0) as a (512, 36) matrix.

    rows: (si*2+sj)*128 + ic  (pre-upsample 2x2 spatial, channels on lanes)
    cols: oi*6 + oj           (6x6 output pixels)
    The 2x nearest upsample is folded in: pre-upsample pixel (si,sj) feeds the
    four upsampled positions (2si+{0,1}, 2sj+{0,1}).
    """
    w = np.asarray(wct2, np.float32)[:, 0]                # (128, 3, 3)
    m = np.zeros((4 * 128, 36), np.float32)
    for si in range(2):
        for sj in range(2):
            r0 = (si * 2 + sj) * 128
            for ui in (2 * si, 2 * si + 1):
                for uj in (2 * sj, 2 * sj + 1):
                    for oi in range(6):
                        for oj in range(6):
                            ki, kj = oi - ui, oj - uj     # padding = 0
                            if 0 <= ki < 3 and 0 <= kj < 3:
                                m[r0:r0 + 128, oi * 6 + oj] += w[:, ki, kj]
    return m


def prepare_params(p):
    """Once per parameter set (outside jit): build MXU-ready layouts."""
    f32 = np.float32
    w1 = np.asarray(p["w1"], f32)                         # (1024, 100)
    w1t = np.zeros((K_PAD, w1.shape[0]), f32)
    w1t[:w1.shape[1], :] = w1.T                           # K: 100 -> 128
    return {
        "w1t": jnp.asarray(w1t, jnp.bfloat16),
        "g1":  jnp.asarray(np.asarray(p["g1"], f32)[None, :]),
        "be1": jnp.asarray(np.asarray(p["be1"], f32)[None, :]),
        "m1":  jnp.asarray(_build_conv1_matrix(p["wct1"]), jnp.bfloat16),
        "g2":  jnp.asarray(np.asarray(p["g2"], f32)[None, :]),
        "be2": jnp.asarray(np.asarray(p["be2"], f32)[None, :]),
        "m2":  jnp.asarray(_build_conv2_matrix(p["wct2"]), jnp.bfloat16),
        "bc2": jnp.full((1, 36), float(np.asarray(p["bct2"])[0]), jnp.float32),
    }


# ------------------------------ pallas_call glue ----------------------------- #

def _full_block(shape):
    zero = (0,) * len(shape)
    return pl.BlockSpec(shape, lambda i, _z=zero: _z)


def simple_gen_forward(x, q):
    """x: (B, 100) f32  ->  (B, 1, 6, 6) f32 (NCHW, matching PyTorch)."""
    B = x.shape[0]
    x_pad = jnp.pad(x, ((0, 0), (0, K_PAD - x.shape[1])))
    args = (x_pad, q["w1t"], q["g1"], q["be1"],
            q["m1"], q["g2"], q["be2"], q["m2"], q["bc2"])
    out = pl.pallas_call(
        simple_gen_kernel,
        grid=(1,),
        in_specs=[_full_block(a.shape) for a in args],
        out_specs=_full_block((B, 36)),
        out_shape=jax.ShapeDtypeStruct((B, 36), jnp.float32),
        compiler_params=pltpu.CompilerParams(dimension_semantics=("arbitrary",)),
    )(*args)
    return out.reshape(B, 1, 6, 6)        # free metadata reshape to NCHW


# ---------------------------- numpy reference ------------------------------- #

def _convT_ref(x, w, b, pad):
    """Direct ConvTranspose2d, stride=1. x: (B,Cin,H,W), w: (Cin,Cout,kh,kw)."""
    B, cin, H, W = x.shape
    _, cout, kh, kw = w.shape
    OH = H - 1 - 2 * pad + kh
    OW = W - 1 - 2 * pad + kw
    full = np.zeros((B, cout, H - 1 + kh, W - 1 + kw), dtype=np.float64)
    for i in range(H):
        for j in range(W):
            full[:, :, i:i + kh, j:j + kw] += np.einsum(
                "bi,iokl->bokl", x[:, :, i, j], w)
    out = full[:, :, pad:pad + OH, pad:pad + OW]
    return out + b[None, :, None, None]


def ref_forward(x, p):
    x = np.asarray(x, np.float64)
    w1, b1 = np.asarray(p["w1"], np.float64), np.asarray(p["b1"], np.float64)
    h = x @ w1.T + b1
    m, v = h.mean(0), h.var(0)
    h = (h - m) / np.sqrt(v + EPS) * np.asarray(p["g1"]) + np.asarray(p["be1"])
    h = np.where(h >= 0, h, NEG_SLOPE * h)
    h = h.reshape(x.shape[0], 256, 2, 2)
    h = _convT_ref(h, np.asarray(p["wct1"], np.float64),
                   np.asarray(p["bct1"], np.float64), pad=1)
    h = np.repeat(np.repeat(h, 2, axis=2), 2, axis=3)
    m = h.mean(axis=(0, 2, 3), keepdims=True)
    v = h.var(axis=(0, 2, 3), keepdims=True)
    h = (h - m) / np.sqrt(v + EPS) * np.asarray(p["g2"])[None, :, None, None] \
        + np.asarray(p["be2"])[None, :, None, None]
    h = np.where(h >= 0, h, NEG_SLOPE * h)
    h = _convT_ref(h, np.asarray(p["wct2"], np.float64),
                   np.asarray(p["bct2"], np.float64), pad=0)
    return np.maximum(h, 0.0)


# ----------------------------------- main ----------------------------------- #

def init_params(key):
    ks = jax.random.split(key, 8)
    f32 = jnp.float32
    return {
        "w1":   0.05 * jax.random.normal(ks[0], (1024, 100), f32),
        "b1":   0.05 * jax.random.normal(ks[1], (1024,), f32),
        "g1":   1.0 + 0.1 * jax.random.normal(ks[2], (1024,), f32),
        "be1":  0.1 * jax.random.normal(ks[3], (1024,), f32),
        "wct1": 0.05 * jax.random.normal(ks[4], (256, 128, 3, 3), f32),
        "bct1": 0.05 * jax.random.normal(ks[5], (128,), f32),
        "g2":   1.0 + 0.1 * jax.random.normal(ks[6], (128,), f32),
        "be2":  0.1 * jax.random.normal(ks[7], (128,), f32),
        "wct2": 0.05 * jax.random.normal(jax.random.fold_in(key, 100),
                                         (128, 1, 3, 3), f32),
        "bct2": 0.05 * jax.random.normal(jax.random.fold_in(key, 101),
                                         (1,), f32),
    }


if __name__ == "__main__":
    key = jax.random.PRNGKey(0)
    params = init_params(key)
    prepped = prepare_params(params)          # host-side, once (hoisted out of jit)
    x = jax.random.normal(jax.random.fold_in(key, 999), (8, 100), jnp.float32)

    fwd = jax.jit(simple_gen_forward)
    out = jax.block_until_ready(fwd(x, prepped))

    assert out.shape == (8, 1, 6, 6), out.shape
    ref = ref_forward(np.asarray(x), params)
    # bf16 MXU operands (f32 accumulation) -> tolerance sized for 1-pass bf16
    # matmuls.  b1 / bct1 are dropped in-kernel (cancelled exactly by the
    # training-mode BatchNorm mean subtraction), so the reference still matches.
    np.testing.assert_allclose(np.asarray(out), ref, rtol=5e-2, atol=5e-2)

    print("KERNEL_OK")
</pallas_src>

<mosaic_0001>
module attributes {stable_mosaic.version = 11 : i64} {
  func.func @simple_gen_kernel(%arg0: i32, %arg1: memref<8x128xf32, #tpu.memory_space<vmem>>, %arg2: memref<128x1024xbf16, #tpu.memory_space<vmem>>, %arg3: memref<1x1024xf32, #tpu.memory_space<vmem>>, %arg4: memref<1x1024xf32, #tpu.memory_space<vmem>>, %arg5: memref<1024x512xbf16, #tpu.memory_space<vmem>>, %arg6: memref<1x128xf32, #tpu.memory_space<vmem>>, %arg7: memref<1x128xf32, #tpu.memory_space<vmem>>, %arg8: memref<512x36xbf16, #tpu.memory_space<vmem>>, %arg9: memref<1x36xf32, #tpu.memory_space<vmem>>, %arg10: memref<8x36xf32, #tpu.memory_space<vmem>>) attributes {dimension_semantics = [#tpu.dimension_semantics<arbitrary>], iteration_bounds = array<i64: 1>, scalar_prefetch = 0 : i64, scratch_operands = 0 : i64, tpu.core_type = #tpu.core_type<tc>, window_params = [{pipeline_mode = #tpu.pipeline_mode<synchronous>, transform_indices = @transform_0, window_bounds = array<i64: 8, 128>}, {pipeline_mode = #tpu.pipeline_mode<synchronous>, transform_indices = @transform_1, window_bounds = array<i64: 128, 1024>}, {pipeline_mode = #tpu.pipeline_mode<synchronous>, transform_indices = @transform_2, window_bounds = array<i64: 1, 1024>}, {pipeline_mode = #tpu.pipeline_mode<synchronous>, transform_indices = @transform_3, window_bounds = array<i64: 1, 1024>}, {pipeline_mode = #tpu.pipeline_mode<synchronous>, transform_indices = @transform_4, window_bounds = array<i64: 1024, 512>}, {pipeline_mode = #tpu.pipeline_mode<synchronous>, transform_indices = @transform_5, window_bounds = array<i64: 1, 128>}, {pipeline_mode = #tpu.pipeline_mode<synchronous>, transform_indices = @transform_6, window_bounds = array<i64: 1, 128>}, {pipeline_mode = #tpu.pipeline_mode<synchronous>, transform_indices = @transform_7, window_bounds = array<i64: 512, 36>}, {pipeline_mode = #tpu.pipeline_mode<synchronous>, transform_indices = @transform_8, window_bounds = array<i64: 1, 36>}, {pipeline_mode = #tpu.pipeline_mode<synchronous>, transform_indices = @transform_9, window_bounds = array<i64: 8, 36>}]} {
    %c0 = arith.constant 0 : index
    %c0_0 = arith.constant 0 : index
    %0 = vector.load %arg1[%c0, %c0_0] : memref<8x128xf32, #tpu.memory_space<vmem>>, vector<8x128xf32>
    %1 = arith.truncf %0 : vector<8x128xf32> to vector<8x128xbf16>
    %c0_1 = arith.constant 0 : index
    %c0_2 = arith.constant 0 : index
    %2 = vector.load %arg2[%c0_1, %c0_2] : memref<128x1024xbf16, #tpu.memory_space<vmem>>, vector<128x1024xbf16>
    %cst = arith.constant dense<0.000000e+00> : vector<8x1024xf32>
    %3 = tpu.matmul %1, %2, %cst {dimension_numbers = #tpu.dot_dimension_numbers<[1], [0], [0], [1], [0, 0, 1, 1], [], []>} : vector<8x128xbf16>, vector<128x1024xbf16>, vector<8x1024xf32> -> vector<8x1024xf32>
    %cst_3 = arith.constant dense<0.000000e+00> : vector<1024xf32>
    %4 = vector.multi_reduction <add>, %3, %cst_3 [0] : vector<8x1024xf32> to vector<1024xf32>
    %5 = vector.shape_cast %4 : vector<1024xf32> to vector<1x1024xf32>
    %cst_4 = arith.constant 8.000000e+00 : f32
    %6 = vector.broadcast %cst_4 : f32 to vector<1x1024xf32>
    %7 = arith.divf %5, %6 : vector<1x1024xf32>
    %8 = vector.broadcast %7 : vector<1x1024xf32> to vector<8x1024xf32>
    %9 = arith.subf %3, %8 : vector<8x1024xf32>
    %10 = arith.mulf %9, %9 : vector<8x1024xf32>
    %cst_5 = arith.constant dense<0.000000e+00> : vector<1024xf32>
    %11 = vector.multi_reduction <add>, %10, %cst_5 [0] : vector<8x1024xf32> to vector<1024xf32>
    %12 = vector.shape_cast %11 : vector<1024xf32> to vector<1x1024xf32>
    %cst_6 = arith.constant 8.000000e+00 : f32
    %13 = vector.broadcast %cst_6 : f32 to vector<1x1024xf32>
    %14 = arith.divf %12, %13 : vector<1x1024xf32>
    %cst_7 = arith.constant 9.99999974E-6 : f32
    %15 = vector.broadcast %cst_7 : f32 to vector<1x1024xf32>
    %16 = arith.addf %14, %15 : vector<1x1024xf32>
    %17 = math.rsqrt %16 : vector<1x1024xf32>
    %c0_8 = arith.constant 0 : index
    %c0_9 = arith.constant 0 : index
    %18 = vector.load %arg3[%c0_8, %c0_9] : memref<1x1024xf32, #tpu.memory_space<vmem>>, vector<1x1024xf32>
    %19 = arith.mulf %17, %18 : vector<1x1024xf32>
    %20 = vector.broadcast %19 : vector<1x1024xf32> to vector<8x1024xf32>
    %21 = arith.mulf %9, %20 : vector<8x1024xf32>
    %c0_10 = arith.constant 0 : index
    %c0_11 = arith.constant 0 : index
    %22 = vector.load %arg4[%c0_10, %c0_11] : memref<1x1024xf32, #tpu.memory_space<vmem>>, vector<1x1024xf32>
    %23 = vector.broadcast %22 : vector<1x1024xf32> to vector<8x1024xf32>
    %24 = arith.addf %21, %23 : vector<8x1024xf32>
    %cst_12 = arith.constant 0.000000e+00 : f32
    %25 = vector.broadcast %cst_12 : f32 to vector<8x1024xf32>
    %26 = arith.cmpf oge, %24, %25 : vector<8x1024xf32>
    %cst_13 = arith.constant 2.000000e-02 : f32
    %27 = vector.broadcast %cst_13 : f32 to vector<8x1024xf32>
    %28 = arith.mulf %27, %24 : vector<8x1024xf32>
    %29 = arith.select %26, %24, %28 : vector<8x1024xi1>, vector<8x1024xf32>
    %30 = arith.truncf %29 : vector<8x1024xf32> to vector<8x1024xbf16>
    %c0_14 = arith.constant 0 : index
    %c0_15 = arith.constant 0 : index
    %31 = vector.load %arg5[%c0_14, %c0_15] : memref<1024x512xbf16, #tpu.memory_space<vmem>>, vector<1024x512xbf16>
    %cst_16 = arith.constant dense<0.000000e+00> : vector<8x512xf32>
    %32 = tpu.matmul %30, %31, %cst_16 {dimension_numbers = #tpu.dot_dimension_numbers<[1], [0], [0], [1], [0, 0, 1, 1], [], []>} : vector<8x1024xbf16>, vector<1024x512xbf16>, vector<8x512xf32> -> vector<8x512xf32>
    %33 = vector.extract_strided_slice %32 {offsets = [0, 0], sizes = [8, 128], strides = [1, 1]} : vector<8x512xf32> to vector<8x128xf32>
    %34 = vector.extract_strided_slice %32 {offsets = [0, 128], sizes = [8, 128], strides = [1, 1]} : vector<8x512xf32> to vector<8x128xf32>
    %35 = vector.extract_strided_slice %32 {offsets = [0, 256], sizes = [8, 128], strides = [1, 1]} : vector<8x512xf32> to vector<8x128xf32>
    %36 = vector.extract_strided_slice %32 {offsets = [0, 384], sizes = [8, 128], strides = [1, 1]} : vector<8x512xf32> to vector<8x128xf32>
    %37 = arith.addf %33, %34 : vector<8x128xf32>
    %38 = arith.addf %37, %35 : vector<8x128xf32>
    %39 = arith.addf %38, %36 : vector<8x128xf32>
    %cst_17 = arith.constant dense<0.000000e+00> : vector<128xf32>
    %40 = vector.multi_reduction <add>, %39, %cst_17 [0] : vector<8x128xf32> to vector<128xf32>
    %41 = vector.shape_cast %40 : vector<128xf32> to vector<1x128xf32>
    %cst_18 = arith.constant 3.125000e-02 : f32
    %42 = vector.broadcast %cst_18 : f32 to vector<1x128xf32>
    %43 = arith.mulf %41, %42 : vector<1x128xf32>
    %44 = vector.broadcast %43 : vector<1x128xf32> to vector<8x128xf32>
    %45 = arith.subf %33, %44 : vector<8x128xf32>
    %46 = vector.broadcast %43 : vector<1x128xf32> to vector<8x128xf32>
    %47 = arith.subf %34, %46 : vector<8x128xf32>
    %48 = vector.broadcast %43 : vector<1x128xf32> to vector<8x128xf32>
    %49 = arith.subf %35, %48 : vector<8x128xf32>
    %50 = vector.broadcast %43 : vector<1x128xf32> to vector<8x128xf32>
    %51 = arith.subf %36, %50 : vector<8x128xf32>
    %52 = arith.mulf %45, %45 : vector<8x128xf32>
    %53 = arith.mulf %47, %47 : vector<8x128xf32>
    %54 = arith.addf %52, %53 : vector<8x128xf32>
    %55 = arith.mulf %49, %49 : vector<8x128xf32>
    %56 = arith.addf %54, %55 : vector<8x128xf32>
    %57 = arith.mulf %51, %51 : vector<8x128xf32>
    %58 = arith.addf %56, %57 : vector<8x128xf32>
    %cst_19 = arith.constant dense<0.000000e+00> : vector<128xf32>
    %59 = vector.multi_reduction <add>, %58, %cst_19 [0] : vector<8x128xf32> to vector<128xf32>
    %60 = vector.shape_cast %59 : vector<128xf32> to vector<1x128xf32>
    %cst_20 = arith.constant 3.125000e-02 : f32
    %61 = vector.broadcast %cst_20 : f32 to vector<1x128xf32>
    %62 = arith.mulf %60, %61 : vector<1x128xf32>
    %cst_21 = arith.constant 9.99999974E-6 : f32
    %63 = vector.broadcast %cst_21 : f32 to vector<1x128xf32>
    %64 = arith.addf %62, %63 : vector<1x128xf32>
    %65 = math.rsqrt %64 : vector<1x128xf32>
    %c0_22 = arith.constant 0 : index
    %c0_23 = arith.constant 0 : index
    %66 = vector.load %arg6[%c0_22, %c0_23] : memref<1x128xf32, #tpu.memory_space<vmem>>, vector<1x128xf32>
    %67 = arith.mulf %65, %66 : vector<1x128xf32>
    %c0_24 = arith.constant 0 : index
    %c0_25 = arith.constant 0 : index
    %68 = vector.load %arg9[%c0_24, %c0_25] : memref<1x36xf32, #tpu.memory_space<vmem>>, vector<1x36xf32>
    %69 = vector.broadcast %67 : vector<1x128xf32> to vector<8x128xf32>
    %70 = arith.mulf %45, %69 : vector<8x128xf32>
    %c0_26 = arith.constant 0 : index
    %c0_27 = arith.constant 0 : index
    %71 = vector.load %arg7[%c0_26, %c0_27] : memref<1x128xf32, #tpu.memory_space<vmem>>, vector<1x128xf32>
    %72 = vector.broadcast %71 : vector<1x128xf32> to vector<8x128xf32>
    %73 = arith.addf %70, %72 : vector<8x128xf32>
    %cst_28 = arith.constant 0.000000e+00 : f32
    %74 = vector.broadcast %cst_28 : f32 to vector<8x128xf32>
    %75 = arith.cmpf oge, %73, %74 : vector<8x128xf32>
    %cst_29 = arith.constant 2.000000e-02 : f32
    %76 = vector.broadcast %cst_29 : f32 to vector<8x128xf32>
    %77 = arith.mulf %76, %73 : vector<8x128xf32>
    %78 = arith.select %75, %73, %77 : vector<8x128xi1>, vector<8x128xf32>
    %79 = arith.truncf %78 : vector<8x128xf32> to vector<8x128xbf16>
    %c0_30 = arith.constant 0 : index
    %c0_31 = arith.constant 0 : index
    %80 = vector.load %arg8[%c0_30, %c0_31] : memref<512x36xbf16, #tpu.memory_space<vmem>>, vector<128x36xbf16>
    %cst_32 = arith.constant dense<0.000000e+00> : vector<8x36xf32>
    %81 = tpu.matmul %79, %80, %cst_32 {dimension_numbers = #tpu.dot_dimension_numbers<[1], [0], [0], [1], [0, 0, 1, 1], [], []>} : vector<8x128xbf16>, vector<128x36xbf16>, vector<8x36xf32> -> vector<8x36xf32>
    %82 = vector.broadcast %68 : vector<1x36xf32> to vector<8x36xf32>
    %83 = arith.addf %82, %81 : vector<8x36xf32>
    %84 = vector.broadcast %67 : vector<1x128xf32> to vector<8x128xf32>
    %85 = arith.mulf %47, %84 : vector<8x128xf32>
    %c0_33 = arith.constant 0 : index
    %c0_34 = arith.constant 0 : index
    %86 = vector.load %arg7[%c0_33, %c0_34] : memref<1x128xf32, #tpu.memory_space<vmem>>, vector<1x128xf32>
    %87 = vector.broadcast %86 : vector<1x128xf32> to vector<8x128xf32>
    %88 = arith.addf %85, %87 : vector<8x128xf32>
    %cst_35 = arith.constant 0.000000e+00 : f32
    %89 = vector.broadcast %cst_35 : f32 to vector<8x128xf32>
    %90 = arith.cmpf oge, %88, %89 : vector<8x128xf32>
    %cst_36 = arith.constant 2.000000e-02 : f32
    %91 = vector.broadcast %cst_36 : f32 to vector<8x128xf32>
    %92 = arith.mulf %91, %88 : vector<8x128xf32>
    %93 = arith.select %90, %88, %92 : vector<8x128xi1>, vector<8x128xf32>
    %94 = arith.truncf %93 : vector<8x128xf32> to vector<8x128xbf16>
    %c128 = arith.constant 128 : index
    %c0_37 = arith.constant 0 : index
    %95 = vector.load %arg8[%c128, %c0_37] : memref<512x36xbf16, #tpu.memory_space<vmem>>, vector<128x36xbf16>
    %cst_38 = arith.constant dense<0.000000e+00> : vector<8x36xf32>
    %96 = tpu.matmul %94, %95, %cst_38 {dimension_numbers = #tpu.dot_dimension_numbers<[1], [0], [0], [1], [0, 0, 1, 1], [], []>} : vector<8x128xbf16>, vector<128x36xbf16>, vector<8x36xf32> -> vector<8x36xf32>
    %97 = arith.addf %83, %96 : vector<8x36xf32>
    %98 = vector.broadcast %67 : vector<1x128xf32> to vector<8x128xf32>
    %99 = arith.mulf %49, %98 : vector<8x128xf32>
    %c0_39 = arith.constant 0 : index
    %c0_40 = arith.constant 0 : index
    %100 = vector.load %arg7[%c0_39, %c0_40] : memref<1x128xf32, #tpu.memory_space<vmem>>, vector<1x128xf32>
    %101 = vector.broadcast %100 : vector<1x128xf32> to vector<8x128xf32>
    %102 = arith.addf %99, %101 : vector<8x128xf32>
    %cst_41 = arith.constant 0.000000e+00 : f32
    %103 = vector.broadcast %cst_41 : f32 to vector<8x128xf32>
    %104 = arith.cmpf oge, %102, %103 : vector<8x128xf32>
    %cst_42 = arith.constant 2.000000e-02 : f32
    %105 = vector.broadcast %cst_42 : f32 to vector<8x128xf32>
    %106 = arith.mulf %105, %102 : vector<8x128xf32>
    %107 = arith.select %104, %102, %106 : vector<8x128xi1>, vector<8x128xf32>
    %108 = arith.truncf %107 : vector<8x128xf32> to vector<8x128xbf16>
    %c256 = arith.constant 256 : index
    %c0_43 = arith.constant 0 : index
    %109 = vector.load %arg8[%c256, %c0_43] : memref<512x36xbf16, #tpu.memory_space<vmem>>, vector<128x36xbf16>
    %cst_44 = arith.constant dense<0.000000e+00> : vector<8x36xf32>
    %110 = tpu.matmul %108, %109, %cst_44 {dimension_numbers = #tpu.dot_dimension_numbers<[1], [0], [0], [1], [0, 0, 1, 1], [], []>} : vector<8x128xbf16>, vector<128x36xbf16>, vector<8x36xf32> -> vector<8x36xf32>
    %111 = arith.addf %97, %110 : vector<8x36xf32>
    %112 = vector.broadcast %67 : vector<1x128xf32> to vector<8x128xf32>
    %113 = arith.mulf %51, %112 : vector<8x128xf32>
    %c0_45 = arith.constant 0 : index
    %c0_46 = arith.constant 0 : index
    %114 = vector.load %arg7[%c0_45, %c0_46] : memref<1x128xf32, #tpu.memory_space<vmem>>, vector<1x128xf32>
    %115 = vector.broadcast %114 : vector<1x128xf32> to vector<8x128xf32>
    %116 = arith.addf %113, %115 : vector<8x128xf32>
    %cst_47 = arith.constant 0.000000e+00 : f32
    %117 = vector.broadcast %cst_47 : f32 to vector<8x128xf32>
    %118 = arith.cmpf oge, %116, %117 : vector<8x128xf32>
    %cst_48 = arith.constant 2.000000e-02 : f32
    %119 = vector.broadcast %cst_48 : f32 to vector<8x128xf32>
    %120 = arith.mulf %119, %116 : vector<8x128xf32>
    %121 = arith.select %118, %116, %120 : vector<8x128xi1>, vector<8x128xf32>
    %122 = arith.truncf %121 : vector<8x128xf32> to vector<8x128xbf16>
    %c384 = arith.constant 384 : index
    %c0_49 = arith.constant 0 : index
    %123 = vector.load %arg8[%c384, %c0_49] : memref<512x36xbf16, #tpu.memory_space<vmem>>, vector<128x36xbf16>
    %cst_50 = arith.constant dense<0.000000e+00> : vector<8x36xf32>
    %124 = tpu.matmul %122, %123, %cst_50 {dimension_numbers = #tpu.dot_dimension_numbers<[1], [0], [0], [1], [0, 0, 1, 1], [], []>} : vector<8x128xbf16>, vector<128x36xbf16>, vector<8x36xf32> -> vector<8x36xf32>
    %125 = arith.addf %111, %124 : vector<8x36xf32>
    %cst_51 = arith.constant 0.000000e+00 : f32
    %126 = vector.broadcast %cst_51 : f32 to vector<8x36xf32>
    %127 = arith.maximumf %125, %126 : vector<8x36xf32>
    %c0_52 = arith.constant 0 : index
    %c0_53 = arith.constant 0 : index
    %128 = vector.load %arg10[%c0_52, %c0_53] : memref<8x36xf32, #tpu.memory_space<vmem>>, vector<8x36xf32>
    tpu.vector_store %arg10[%c0_52, %c0_53], %127 {strides = array<i32>} : memref<8x36xf32, #tpu.memory_space<vmem>>, vector<8x36xf32>,
    return
  }
  func.func @transform_0(%arg0: i32) -> (i32, i32) {
    %c0_i32 = arith.constant 0 : i32
    %c0_i32_0 = arith.constant 0 : i32
    %c0_i32_1 = arith.constant 0 : i32
    return %c0_i32, %c0_i32_0 : i32, i32
  }
  func.func @transform_1(%arg0: i32) -> (i32, i32) {
    %c0_i32 = arith.constant 0 : i32
    %c0_i32_0 = arith.constant 0 : i32
    %c0_i32_1 = arith.constant 0 : i32
    return %c0_i32, %c0_i32_0 : i32, i32
  }
  func.func @transform_2(%arg0: i32) -> (i32, i32) {
    %c0_i32 = arith.constant 0 : i32
    %c0_i32_0 = arith.constant 0 : i32
    %c0_i32_1 = arith.constant 0 : i32
    return %c0_i32, %c0_i32_0 : i32, i32
  }
  func.func @transform_3(%arg0: i32) -> (i32, i32) {
    %c0_i32 = arith.constant 0 : i32
    %c0_i32_0 = arith.constant 0 : i32
    %c0_i32_1 = arith.constant 0 : i32
    return %c0_i32, %c0_i32_0 : i32, i32
  }
  func.func @transform_4(%arg0: i32) -> (i32, i32) {
    %c0_i32 = arith.constant 0 : i32
    %c0_i32_0 = arith.constant 0 : i32
    %c0_i32_1 = arith.constant 0 : i32
    return %c0_i32, %c0_i32_0 : i32, i32
  }
  func.func @transform_5(%arg0: i32) -> (i32, i32) {
    %c0_i32 = arith.constant 0 : i32
    %c0_i32_0 = arith.constant 0 : i32
    %c0_i32_1 = arith.constant 0 : i32
    return %c0_i32, %c0_i32_0 : i32, i32
  }
  func.func @transform_6(%arg0: i32) -> (i32, i32) {
    %c0_i32 = arith.constant 0 : i32
    %c0_i32_0 = arith.constant 0 : i32
    %c0_i32_1 = arith.constant 0 : i32
    return %c0_i32, %c0_i32_0 : i32, i32
  }
  func.func @transform_7(%arg0: i32) -> (i32, i32) {
    %c0_i32 = arith.constant 0 : i32
    %c0_i32_0 = arith.constant 0 : i32
    %c0_i32_1 = arith.constant 0 : i32
    return %c0_i32, %c0_i32_0 : i32, i32
  }
  func.func @transform_8(%arg0: i32) -> (i32, i32) {
    %c0_i32 = arith.constant 0 : i32
    %c0_i32_0 = arith.constant 0 : i32
    %c0_i32_1 = arith.constant 0 : i32
    return %c0_i32, %c0_i32_0 : i32, i32
  }
  func.func @transform_9(%arg0: i32) -> (i32, i32) {
    %c0_i32 = arith.constant 0 : i32
    %c0_i32_0 = arith.constant 0 : i32
    %c0_i32_1 = arith.constant 0 : i32
    return %c0_i32, %c0_i32_0 : i32, i32
  }
}

</mosaic_0001>

<bundles_post_ra>
// kernel: simple_gen_forward.1
= control target key start
LH: loop header
LB: loop body
LE: loop exit
PB: predicated region body
PF: predicated region fallthrough
CT: control target
= control target key end

     0   :  { %14 = vsyncpa [#allocation3], 0  ;;  %s4667_s0 = inlined_call_operand.vmem [shape: f32[8,128], index: 0, kind: input, shape index: {}]   ;;  %s4668_s1 = inlined_call_operand.hbm [shape: bf16[128,1024], index: 1, kind: input, shape index: {}]   ;;  %s4669_s2 = inlined_call_operand.vmem [shape: f32[1,1024], index: 2, kind: input, shape index: {}]   ;;  %s4670_s3 = inlined_call_operand.vmem [shape: f32[1,1024], index: 3, kind: input, shape index: {}]   ;;  %s4671_s4 = inlined_call_operand.hbm [shape: bf16[1024,512], index: 4, kind: input, shape index: {}]   ;;  %s4672_s5 = inlined_call_operand.vmem [shape: f32[1,128], index: 5, kind: input, shape index: {}]   ;;  %s4673_s6 = inlined_call_operand.vmem [shape: f32[1,128], index: 6, kind: input, shape index: {}]   ;;  %s4674_s7 = inlined_call_operand.vmem [shape: bf16[512,36], index: 7, kind: input, shape index: {}]   ;;  %s4675_s8 = inlined_call_operand.vmem [shape: f32[1,36], index: 8, kind: input, shape index: {}]   ;;  %s4676_s9 = inlined_call_operand.vmem [shape: f32[8,36], index: 9, kind: output, shape index: {}]  }
   0x1   :  { %15 = vsyncpa [#allocation5], 0  ;;  %s4291_s30 = smov [#allocation2]   ;;  %s4243_s13 = scalar_lea.hbm %s4668_s1, 8192 }
   0x2   :  { %s23_s10 = sshll.u32 %s4291_s30, 4  ;;  %p4244_p0 = scmp.ne.s32.totalorder %s4668_s1, %s4243_s13  ;;  %s24_s10 = int_to_ptr.vmem [resolvable:$true] %s23_s10 }
   0x3   :  { %p4247_p1 = scmp.lt.u32.totalorder %s4243_s13, %s4668_s1 }
   0x5   :  { %p4249_p2 = pnand %p4247_p1, %p4244_p0 }
   0x7   :  { %4252 = shalt.err (!%p4249_p2)
}
   0x8   :  { %s4253_s18 = scalar_lea.vmem %s24_s10, 8192  ;;  %p4258_p4 = scmp.lt.s32.totalorder %s24_s10, %s24_s10 }
   0x9   :  { %p4254_p3 = scmp.ne.s32.totalorder %s24_s10, %s4253_s18  ;;  %p4259_p5 = scmp.lt.s32.totalorder %s4253_s18, %s4253_s18 }
   0xb   :  { %p4260_p6 = por %p4259_p5, %p4258_p4 }
   0xd   :  { %p4261_p7 = pnand %p4260_p6, %p4254_p3 }
   0xf   :  { %4264 = shalt.err (!%p4261_p7)
}
  0x10   :  { %s4292_s19 = smov 512   ;;  %s4293_s20 = smov 32  }
  0x11   :  { %29 = dma.hbm_to_vmem [thread:$0]  %s4668_s1, 8192, %s24_s10, [#allocation3], %s4292_s19, %s4292_s19, %s4293_s20  }
  0x12   :  { %s4294_s23 = smov [#allocation4]   ;;  %s4265_s27 = scalar_lea.hbm %s4671_s4, 32768 }
  0x13   :  { %s39_s24 = sshll.u32 %s4294_s23, 4  ;;  %p4266_p8 = scmp.ne.s32.totalorder %s4671_s4, %s4265_s27  ;;  %s40_s24 = int_to_ptr.vmem [resolvable:$true] %s39_s24 }
  0x14   :  { %p4269_p9 = scmp.lt.u32.totalorder %s4265_s27, %s4671_s4 }
  0x16   :  { %p4271_p10 = pnand %p4269_p9, %p4266_p8 }
  0x18   :  { %4274 = shalt.err (!%p4271_p10)
}
  0x19   :  { %s4275_s12 = scalar_lea.vmem %s40_s24, 32768  ;;  %p4280_p12 = scmp.lt.s32.totalorder %s40_s24, %s40_s24 }
  0x1a   :  { %p4276_p11 = scmp.ne.s32.totalorder %s40_s24, %s4275_s12  ;;  %p4281_p13 = scmp.lt.s32.totalorder %s4275_s12, %s4275_s12 }
  0x1c   :  { %p4282_p0 = por %p4281_p13, %p4280_p12 }
  0x1e   :  { %p4283_p1 = pnand %p4282_p0, %p4276_p11 }
  0x20   :  { %4286 = shalt.err (!%p4283_p1)
}
  0x21   :  { %s4295_s1 = smov 256   ;;  %s4296_s10 = smov 16  }
  0x22   :  { %45 = dma.hbm_to_vmem [thread:$0]  %s4671_s4, 32768, %s40_s24, [#allocation5], %s4295_s1, %s4295_s1, %s4296_s10  }
  0x23   :  { %4287 = dma.done.wait [#allocation3], 8192  }
  0x24   :  { %4288 = vsyncadd [#allocation3], 4294959104 }
  0x25   :  { %4289 = dma.done.wait [#allocation5], 32768  }
  0x26   :  { %4290 = vsyncadd [#allocation5], 4294934528  ;;  %v4297_v0 = vmov 0   ;;  %v63_v1 = vld [vmem:[#allocation2] sm:$0xff]  ;;  %v64_v3 = vld [vmem:[#allocation2 + $0x8] sm:$0xff]  ;;  %vm4299_vm8 = vmmov 0  }
  0x27   :  { %479 = vmatprep.mubr.bf16.mxu0 %v4297_v0  ;;  %520 = vmatprep.mubr.bf16.mxu1 %v4297_v0  ;;  %v67_v2 = vld [vmem:[#allocation2 + $0x20] sm:$0xff]  ;;  %v68_v5 = vld [vmem:[#allocation2 + $0x28] sm:$0xff]  ;;  %v65_v60 = vld [vmem:[#allocation2 + $0x10] sm:$0xff]  ;;  %vm3287_vm13 = vcmask 293888  }
  0x28   :  { %v3296_v4 = vcombine.high %v63_v1, %v67_v2  ;;  %v3295_v6 = vcombine.low %v63_v1, %v67_v2  ;;  %v71_v7 = vld [vmem:[#allocation2 + $0x40] sm:$0xff]  ;;  %v3298_v9 = vcombine.high %v64_v3, %v68_v5  ;;  %v3297_v10 = vcombine.low %v64_v3, %v68_v5  ;;  %v72_v12 = vld [vmem:[#allocation2 + $0x48] sm:$0xff]  ;;  %v69_v61 = vld [vmem:[#allocation2 + $0x30] sm:$0xff] }
  0x29   :  { %v75_v8 = vld [vmem:[#allocation2 + $0x60] sm:$0xff]  ;;  %v76_v13 = vld [vmem:[#allocation2 + $0x68] sm:$0xff]  ;;  %v66_v1 = vld [vmem:[#allocation2 + $0x18] sm:$0xff] }
  0x2a   :  { %v3304_v11 = vcombine.high %v71_v7, %v75_v8  ;;  %v79_v14 = vld [vmem:[#allocation2 + $0x80] sm:$0xff]  ;;  %447 = vmatprep.subr.bf16.mxu0 %v3296_v4  ;;  %v3306_v15 = vcombine.high %v72_v12, %v76_v13  ;;  %v80_v17 = vld [vmem:[#allocation2 + $0x88] sm:$0xff]  ;;  %488 = vmatprep.subr.bf16.mxu1 %v3298_v9  ;;  %v3303_v19 = vcombine.low %v71_v7, %v75_v8  ;;  %v70_v2 = vld [vmem:[#allocation2 + $0x38] sm:$0xff] }
  0x2b   :  { %v83_v16 = vld [vmem:[#allocation2 + $0xa0] sm:$0xff]  ;;  %v84_v18 = vld [vmem:[#allocation2 + $0xa8] sm:$0xff]  ;;  %448 = vmatpush1.bf16.msra.mxu0 %v3295_v6  ;;  %489 = vmatpush1.bf16.msra.mxu1 %v3297_v10  ;;  %v3305_v20 = vcombine.low %v72_v12, %v76_v13  ;;  %v73_v6 = vld [vmem:[#allocation2 + $0x50] sm:$0xff]  ;;  %v3300_v9 = vcombine.high %v65_v60, %v69_v61  ;;  %v3302_v10 = vcombine.high %v66_v1, %v70_v2 }
  0x2c   :  { %449 = vmatprep.subr.bf16.mxu0 %v3304_v11  ;;  %v3312_v21 = vcombine.high %v79_v14, %v83_v16  ;;  %490 = vmatprep.subr.bf16.mxu1 %v3306_v15  ;;  %v3314_v22 = vcombine.high %v80_v17, %v84_v18  ;;  %v87_v23 = vld [vmem:[#allocation2 + $0xc0] sm:$0xff]  ;;  %v88_v25 = vld [vmem:[#allocation2 + $0xc8] sm:$0xff]  ;;  %v3311_v27 = vcombine.low %v79_v14, %v83_v16  ;;  %v77_v7 = vld [vmem:[#allocation2 + $0x70] sm:$0xff] }
  0x2d   :  { %v91_v24 = vld [vmem:[#allocation2 + $0xe0] sm:$0xff]  ;;  %v92_v26 = vld [vmem:[#allocation2 + $0xe8] sm:$0xff]  ;;  %v3313_v28 = vcombine.low %v80_v17, %v84_v18  ;;  %v74_v11 = vld [vmem:[#allocation2 + $0x58] sm:$0xff]  ;;  %v3299_v14 = vcombine.low %v65_v60, %v69_v61  ;;  %v3308_v17 = vcombine.high %v73_v6, %v77_v7  ;;  %v3301_v18 = vcombine.low %v66_v1, %v70_v2 }
  0x2e   :  { %v3320_v29 = vcombine.high %v87_v23, %v91_v24  ;;  %v3322_v30 = vcombine.high %v88_v25, %v92_v26  ;;  %v95_v31 = vld [vmem:[#allocation2 + $0x100] sm:$0xff]  ;;  %v96_v33 = vld [vmem:[#allocation2 + $0x108] sm:$0xff]  ;;  %v3319_v35 = vcombine.low %v87_v23, %v91_v24  ;;  %v3321_v36 = vcombine.low %v88_v25, %v92_v26  ;;  %v78_v12 = vld [vmem:[#allocation2 + $0x78] sm:$0xff] }
  0x2f   :  { %450 = vmatpush1.bf16.msra.mxu0 %v3303_v19  ;;  %491 = vmatpush1.bf16.msra.mxu1 %v3305_v20  ;;  %v99_v32 = vld [vmem:[#allocation2 + $0x120] sm:$0xff]  ;;  %v100_v34 = vld [vmem:[#allocation2 + $0x128] sm:$0xff]  ;;  %v81_v15 = vld [vmem:[#allocation2 + $0x90] sm:$0xff]  ;;  %v3309_v26 = vcombine.low %v74_v11, %v78_v12 }
  0x30   :  { %451 = vmatprep.subr.bf16.mxu0 %v3312_v21  ;;  %492 = vmatprep.subr.bf16.mxu1 %v3314_v22  ;;  %v3328_v37 = vcombine.high %v95_v31, %v99_v32  ;;  %v3330_v38 = vcombine.high %v96_v33, %v100_v34  ;;  %v103_v39 = vld [vmem:[#allocation2 + $0x140] sm:$0xff]  ;;  %v104_v41 = vld [vmem:[#allocation2 + $0x148] sm:$0xff]  ;;  %v3327_v43 = vcombine.low %v95_v31, %v99_v32  ;;  %v85_v16 = vld [vmem:[#allocation2 + $0xb0] sm:$0xff] }
  0x31   :  { %v107_v40 = vld [vmem:[#allocation2 + $0x160] sm:$0xff]  ;;  %v108_v42 = vld [vmem:[#allocation2 + $0x168] sm:$0xff]  ;;  %v3329_v44 = vcombine.low %v96_v33, %v100_v34  ;;  %v82_v19 = vld [vmem:[#allocation2 + $0x98] sm:$0xff]  ;;  %v3310_v21 = vcombine.high %v74_v11, %v78_v12  ;;  %v3307_v22 = vcombine.low %v73_v6, %v77_v7  ;;  %v3316_v25 = vcombine.high %v81_v15, %v85_v16 }
  0x32   :  { %v3336_v45 = vcombine.high %v103_v39, %v107_v40  ;;  %v3338_v46 = vcombine.high %v104_v41, %v108_v42  ;;  %v111_v47 = vld [vmem:[#allocation2 + $0x180] sm:$0xff]  ;;  %v112_v49 = vld [vmem:[#allocation2 + $0x188] sm:$0xff]  ;;  %v3335_v51 = vcombine.low %v103_v39, %v107_v40  ;;  %v3337_v52 = vcombine.low %v104_v41, %v108_v42  ;;  %v86_v20 = vld [vmem:[#allocation2 + $0xb8] sm:$0xff] }
  0x33   :  { %452 = vmatpush1.bf16.msra.mxu0 %v3311_v27  ;;  %493 = vmatpush1.bf16.msra.mxu1 %v3313_v28  ;;  %v115_v48 = vld [vmem:[#allocation2 + $0x1a0] sm:$0xff]  ;;  %v116_v50 = vld [vmem:[#allocation2 + $0x1a8] sm:$0xff]  ;;  %v89_v23 = vld [vmem:[#allocation2 + $0xd0] sm:$0xff]  ;;  %v3317_v34 = vcombine.low %v82_v19, %v86_v20 }
  0x34   :  { %453 = vmatprep.subr.bf16.mxu0 %v3320_v29  ;;  %494 = vmatprep.subr.bf16.mxu1 %v3322_v30  ;;  %v3344_v53 = vcombine.high %v111_v47, %v115_v48  ;;  %v119_v54 = vld [vmem:[#allocation2 + $0x1c0] sm:$0xff]  ;;  %v3346_v55 = vcombine.high %v112_v49, %v116_v50  ;;  %v120_v57 = vld [vmem:[#allocation2 + $0x1c8] sm:$0xff]  ;;  %v3343_v59 = vcombine.low %v111_v47, %v115_v48  ;;  %v93_v24 = vld [vmem:[#allocation2 + $0xf0] sm:$0xff] }
  0x35   :  { %v123_v56 = vld [vmem:[#allocation2 + $0x1e0] sm:$0xff]  ;;  %v124_v58 = vld [vmem:[#allocation2 + $0x1e8] sm:$0xff]  ;;  %v3345_v62 = vcombine.low %v112_v49, %v116_v50  ;;  %v90_v27 = vld [vmem:[#allocation2 + $0xd8] sm:$0xff]  ;;  %v3318_v29 = vcombine.high %v82_v19, %v86_v20  ;;  %v3315_v30 = vcombine.low %v81_v15, %v85_v16  ;;  %v3324_v33 = vcombine.high %v89_v23, %v93_v24 }
  0x36   :  { %v3352_v63 = vcombine.high %v119_v54, %v123_v56  ;;  %v3354_v3 = vcombine.high %v120_v57, %v124_v58  ;;  %v61_v4 = vld [vmem:[%s4667_s0] sm:$0xff]  ;;  %v3351_v5 = vcombine.low %v119_v54, %v123_v56  ;;  %v3353_v8 = vcombine.low %v120_v57, %v124_v58  ;;  %v94_v28 = vld [vmem:[#allocation2 + $0xf8] sm:$0xff]  ;;  %v97_v31 = vld [vmem:[#allocation2 + $0x110] sm:$0xff] }
  0x37   :  { %454 = vmatpush1.bf16.msra.mxu0 %v3319_v35  ;;  %495 = vmatpush1.bf16.msra.mxu1 %v3321_v36  ;;  %v4379_v13 = vpack.c.bf16 %v61_v4, %v61_v4  ;;  %v101_v32 = vld [vmem:[#allocation2 + $0x130] sm:$0xff]  ;;  %v98_v35 = vld [vmem:[#allocation2 + $0x118] sm:$0xff]  ;;  %v3325_v41 = vcombine.low %v90_v27, %v94_v28 }
  0x38   :  { %455 = vmatprep.subr.bf16.mxu0 %v3328_v37  ;;  %496 = vmatprep.subr.bf16.mxu1 %v3330_v38  ;;  %v102_v36 = vld [vmem:[#allocation2 + $0x138] sm:$0xff]  ;;  %v3326_v37 = vcombine.high %v90_v27, %v94_v28  ;;  %v3323_v38 = vcombine.low %v89_v23, %v93_v24  ;;  %v105_v39 = vld [vmem:[#allocation2 + $0x150] sm:$0xff] }
  0x39   :  { %v109_v40 = vld [vmem:[#allocation2 + $0x170] sm:$0xff]  ;;  %v106_v42 = vld [vmem:[#allocation2 + $0x158] sm:$0xff]  ;;  %v3333_v49 = vcombine.low %v98_v35, %v102_v36 }
  0x3a   :  { %v117_v47 = vld [vmem:[#allocation2 + $0x1b0] sm:$0xff]  ;;  %v3340_v48 = vcombine.high %v105_v39, %v109_v40  ;;  %v114_v50 = vld [vmem:[#allocation2 + $0x198] sm:$0xff] }
  0x3b   :  { %456 = vmatpush1.bf16.msra.mxu0 %v3327_v43  ;;  %497 = vmatpush1.bf16.msra.mxu1 %v3329_v44  ;;  %v110_v43 = vld [vmem:[#allocation2 + $0x178] sm:$0xff]  ;;  %v3334_v44 = vcombine.high %v98_v35, %v102_v36  ;;  %v121_v54 = vld [vmem:[#allocation2 + $0x1d0] sm:$0xff] }
  0x3c   :  { %457 = vmatprep.subr.bf16.mxu0 %v3336_v45  ;;  %498 = vmatprep.subr.bf16.mxu1 %v3338_v46  ;;  %v3331_v45 = vcombine.low %v97_v31, %v101_v32  ;;  %v113_v46 = vld [vmem:[#allocation2 + $0x190] sm:$0xff]  ;;  %v3341_v57 = vcombine.low %v106_v42, %v110_v43  ;;  %v122_v58 = vld [vmem:[#allocation2 + $0x1d8] sm:$0xff] }
  0x3d   :  { %v3348_v56 = vcombine.high %v113_v46, %v117_v47  ;;  %v3347_v61 = vcombine.low %v113_v46, %v117_v47  ;;  %v3814_v2 = vld [vmem:[#allocation4 + $0x204] ss:$16 sps:$4 sm:$0xff]   ;;  %v3812_v6 = vld [vmem:[#allocation4 + $0x200] ss:$16 sps:$4 sm:$0xff]  }
  0x3e   :  { %v3811_v4 = vld [vmem:[#allocation4 + $0x4] ss:$16 sps:$4 sm:$0xff]   ;;  %v3809_v7 = vld [vmem:[#allocation4] ss:$16 sps:$4 sm:$0xff]  }
  0x3f   :  { %458 = vmatpush1.bf16.msra.mxu0 %v3335_v51  ;;  %499 = vmatpush1.bf16.msra.mxu1 %v3337_v52  ;;  %v118_v51 = vld [vmem:[#allocation2 + $0x1b8] sm:$0xff]  ;;  %v3342_v52 = vcombine.high %v106_v42, %v110_v43  ;;  %v3818_v11 = vld [vmem:[#allocation4 + $0x220] ss:$16 sps:$4 sm:$0xff]   ;;  %v3823_v12 = vld [vmem:[#allocation4 + $0x44] ss:$16 sps:$4 sm:$0xff]  }
  0x40   :  { %459 = vmatprep.subr.bf16.mxu0 %v3344_v53  ;;  %500 = vmatprep.subr.bf16.mxu1 %v3346_v55  ;;  %v3339_v53 = vcombine.low %v105_v39, %v109_v40  ;;  %v125_v55 = vld [vmem:[#allocation2 + $0x1f0] sm:$0xff]  ;;  %v3350_v60 = vcombine.high %v114_v50, %v118_v51 }
  0x41   :  { %v3821_v15 = vld [vmem:[#allocation4 + $0x40] ss:$16 sps:$4 sm:$0xff]   ;;  %v3835_v20 = vld [vmem:[#allocation4 + $0x84] ss:$16 sps:$4 sm:$0xff]  }
  0x42   :  { %v3824_v16 = vld [vmem:[#allocation4 + $0x240] ss:$16 sps:$4 sm:$0xff]   ;;  %v3841_v24 = vld [vmem:[#allocation4 + $0xa4] ss:$16 sps:$4 sm:$0xff]  }
  0x43   :  { %460 = vmatpush1.bf16.msra.mxu0 %v3343_v59  ;;  %501 = vmatpush1.bf16.msra.mxu1 %v3345_v62  ;;  %v126_v59 = vld [vmem:[#allocation2 + $0x1f8] sm:$0xff]  ;;  %v3356_v62 = vcombine.high %v121_v54, %v125_v55  ;;  %v3830_v19 = vld [vmem:[#allocation4 + $0x260] ss:$16 sps:$4 sm:$0xff]   ;;  %v3847_v28 = vld [vmem:[#allocation4 + $0xc4] ss:$16 sps:$4 sm:$0xff]  }
  0x44   :  { %461 = vmatprep.subr.bf16.mxu0 %v3352_v63  ;;  %502 = vmatprep.subr.bf16.mxu1 %v3354_v3  ;;  %v3349_v63 = vcombine.low %v114_v50, %v118_v51  ;;  %v3358_v1 = vcombine.high %v122_v58, %v126_v59  ;;  %v3355_v3 = vcombine.low %v121_v54, %v125_v55  ;;  %v3836_v23 = vld [vmem:[#allocation4 + $0x280] ss:$16 sps:$4 sm:$0xff]   ;;  %v3859_v36 = vld [vmem:[#allocation4 + $0x104] ss:$16 sps:$4 sm:$0xff]  }
  0x45   :  { %v3842_v27 = vld [vmem:[#allocation4 + $0x2a0] ss:$16 sps:$4 sm:$0xff]   ;;  %v3865_v40 = vld [vmem:[#allocation4 + $0x124] ss:$16 sps:$4 sm:$0xff]  }
  0x46   :  { %v3854_v35 = vld [vmem:[#allocation4 + $0x2e0] ss:$16 sps:$4 sm:$0xff]   ;;  %v3871_v43 = vld [vmem:[#allocation4 + $0x144] ss:$16 sps:$4 sm:$0xff]  }
  0x47   :  { %462 = vmatpush1.bf16.msra.mxu0 %v3351_v5  ;;  %503 = vmatpush1.bf16.msra.mxu1 %v3353_v8  ;;  %v3357_v5 = vcombine.low %v122_v58, %v126_v59  ;;  %v3817_v8 = vld [vmem:[#allocation4 + $0x24] ss:$16 sps:$4 sm:$0xff]   ;;  %v3860_v39 = vld [vmem:[#allocation4 + $0x300] ss:$16 sps:$4 sm:$0xff]  }
  0x48   :  { %529 = vmatprep.subr.bf16.mxu0 %v3300_v9  ;;  %570 = vmatprep.subr.bf16.mxu1 %v3302_v10  ;;  %v3820_v9 = vld [vmem:[#allocation4 + $0x224] ss:$16 sps:$4 sm:$0xff]   ;;  %v3815_v10 = vld [vmem:[#allocation4 + $0x20] ss:$16 sps:$4 sm:$0xff]  }
  0x49   :  { %v3866_v42 = vld [vmem:[#allocation4 + $0x320] ss:$16 sps:$4 sm:$0xff]   ;;  %v3877_v47 = vld [vmem:[#allocation4 + $0x164] ss:$16 sps:$4 sm:$0xff]  }
  0x4a   :  { %480 = vmatmul.mubr.bf16.vlgmr.msra.gmra.mrb[0].mxu0 %v4379_v13  ;;  %521 = vmatmul.mubr.bf16.vlgmr.msra.gmra.mrb[0].mxu1 %v4379_v13  ;;  %v3872_v46 = vld [vmem:[#allocation4 + $0x340] ss:$16 sps:$4 sm:$0xff]   ;;  %v3883_v51 = vld [vmem:[#allocation4 + $0x184] ss:$16 sps:$4 sm:$0xff]  }
  0x4b   :  { %530 = vmatpush1.bf16.msra.mxu0 %v3299_v14  ;;  %561 = vmatprep.mubr.bf16.mxu0 %v4297_v0  ;;  %v3826_v14 = vld [vmem:[#allocation4 + $0x244] ss:$16 sps:$4 sm:$0xff]   ;;  %v3878_v50 = vld [vmem:[#allocation4 + $0x360] ss:$16 sps:$4 sm:$0xff]  }
  0x4c   :  { %531 = vmatprep.subr.bf16.mxu0 %v3308_v17  ;;  %571 = vmatpush1.bf16.msra.mxu1 %v3301_v18  ;;  %v3829_v17 = vld [vmem:[#allocation4 + $0x64] ss:$16 sps:$4 sm:$0xff]   ;;  %v3884_v54 = vld [vmem:[#allocation4 + $0x380] ss:$16 sps:$4 sm:$0xff]  }
  0x4d   :  { %602 = vmatprep.mubr.bf16.mxu1 %v4297_v0  ;;  %572 = vmatprep.subr.bf16.mxu1 %v3310_v21  ;;  %v3332_v0 = vcombine.high %v97_v31, %v101_v32  ;;  %v3832_v18 = vld [vmem:[#allocation4 + $0x264] ss:$16 sps:$4 sm:$0xff]   ;;  %v3848_v31 = vld [vmem:[#allocation4 + $0x2c0] ss:$16 sps:$4 sm:$0xff]  }
  0x4e   :  { %v3838_v21 = vld [vmem:[#allocation4 + $0x284] ss:$16 sps:$4 sm:$0xff]   ;;  %v3890_v58 = vld [vmem:[#allocation4 + $0x3a0] ss:$16 sps:$4 sm:$0xff]  }
  0x4f   :  { %532 = vmatpush1.bf16.msra.mxu0 %v3307_v22  ;;  %v3833_v22 = vld [vmem:[#allocation4 + $0x80] ss:$16 sps:$4 sm:$0xff]   ;;  %v3853_v32 = vld [vmem:[#allocation4 + $0xe4] ss:$16 sps:$4 sm:$0xff]  }
  0x50   :  { %533 = vmatprep.subr.bf16.mxu0 %v3316_v25  ;;  %573 = vmatpush1.bf16.msra.mxu1 %v3309_v26  ;;  %v3844_v25 = vld [vmem:[#allocation4 + $0x2a4] ss:$16 sps:$4 sm:$0xff]   ;;  %v3839_v26 = vld [vmem:[#allocation4 + $0xa0] ss:$16 sps:$4 sm:$0xff]  }
  0x51   :  { %574 = vmatprep.subr.bf16.mxu1 %v3318_v29  ;;  %v3850_v29 = vld [vmem:[#allocation4 + $0x2c4] ss:$16 sps:$4 sm:$0xff]  }
  0x52   :  { %v3889_v55 = vld [vmem:[#allocation4 + $0x1a4] ss:$16 sps:$4 sm:$0xff]  }
  0x53   :  { %534 = vmatpush1.bf16.msra.mxu0 %v3315_v30  ;;  %v3845_v30 = vld [vmem:[#allocation4 + $0xc0] ss:$16 sps:$4 sm:$0xff]   ;;  %v3895_v59 = vld [vmem:[#allocation4 + $0x1c4] ss:$16 sps:$4 sm:$0xff]  }
  0x54   :  { %535 = vmatprep.subr.bf16.mxu0 %v3324_v33  ;;  %575 = vmatpush1.bf16.msra.mxu1 %v3317_v34  ;;  %v3856_v33 = vld [vmem:[#allocation4 + $0x2e4] ss:$16 sps:$4 sm:$0xff]   ;;  %v3851_v34 = vld [vmem:[#allocation4 + $0xe0] ss:$16 sps:$4 sm:$0xff]  }
  0x55   :  { %576 = vmatprep.subr.bf16.mxu1 %v3326_v37  ;;  %v3862_v37 = vld [vmem:[#allocation4 + $0x304] ss:$16 sps:$4 sm:$0xff]  }
  0x57   :  { %536 = vmatpush1.bf16.msra.mxu0 %v3323_v38  ;;  %v3857_v38 = vld [vmem:[#allocation4 + $0x100] ss:$16 sps:$4 sm:$0xff]  }
  0x58   :  { %537 = vmatprep.subr.bf16.mxu0 %v3332_v0  ;;  %577 = vmatpush1.bf16.msra.mxu1 %v3325_v41  ;;  %v3868_v0 = vld [vmem:[#allocation4 + $0x324] ss:$16 sps:$4 sm:$0xff]   ;;  %v3863_v41 = vld [vmem:[#allocation4 + $0x120] ss:$16 sps:$4 sm:$0xff]  }
  0x59   :  { %578 = vmatprep.subr.bf16.mxu1 %v3334_v44  ;;  %v3874_v44 = vld [vmem:[#allocation4 + $0x344] ss:$16 sps:$4 sm:$0xff]  }
  0x5b   :  { %538 = vmatpush1.bf16.msra.mxu0 %v3331_v45  ;;  %v3869_v45 = vld [vmem:[#allocation4 + $0x140] ss:$16 sps:$4 sm:$0xff]  }
  0x5c   :  { %539 = vmatprep.subr.bf16.mxu0 %v3340_v48  ;;  %579 = vmatpush1.bf16.msra.mxu1 %v3333_v49  ;;  %v3880_v48 = vld [vmem:[#allocation4 + $0x364] ss:$16 sps:$4 sm:$0xff]   ;;  %v3875_v49 = vld [vmem:[#allocation4 + $0x160] ss:$16 sps:$4 sm:$0xff]  }
  0x5d   :  { %580 = vmatprep.subr.bf16.mxu1 %v3342_v52  ;;  %v3886_v52 = vld [vmem:[#allocation4 + $0x384] ss:$16 sps:$4 sm:$0xff]  }
  0x5f   :  { %540 = vmatpush1.bf16.msra.mxu0 %v3339_v53  ;;  %v3881_v53 = vld [vmem:[#allocation4 + $0x180] ss:$16 sps:$4 sm:$0xff]  }
  0x60   :  { %541 = vmatprep.subr.bf16.mxu0 %v3348_v56  ;;  %581 = vmatpush1.bf16.msra.mxu1 %v3341_v57  ;;  %v3892_v56 = vld [vmem:[#allocation4 + $0x3a4] ss:$16 sps:$4 sm:$0xff]   ;;  %v3887_v57 = vld [vmem:[#allocation4 + $0x1a0] ss:$16 sps:$4 sm:$0xff]  }
  0x61   :  { %582 = vmatprep.subr.bf16.mxu1 %v3350_v60  ;;  %v3898_v60 = vld [vmem:[#allocation4 + $0x3c4] ss:$16 sps:$4 sm:$0xff]  }
  0x63   :  { %542 = vmatpush1.bf16.msra.mxu0 %v3347_v61  ;;  %v3893_v61 = vld [vmem:[#allocation4 + $0x1c0] ss:$16 sps:$4 sm:$0xff]  }
  0x64   :  { %543 = vmatprep.subr.bf16.mxu0 %v3356_v62  ;;  %583 = vmatpush1.bf16.msra.mxu1 %v3349_v63  ;;  %v3896_v62 = vld [vmem:[#allocation4 + $0x3c0] ss:$16 sps:$4 sm:$0xff]  }
  0x65   :  { %584 = vmatprep.subr.bf16.mxu1 %v3358_v1  ;;  %v3899_v63 = vld [vmem:[#allocation4 + $0x1e0] ss:$16 sps:$4 sm:$0xff]   ;;  %v3901_v1 = vld [vmem:[#allocation4 + $0x1e4] ss:$16 sps:$4 sm:$0xff]  }
  0x67   :  { %544 = vmatpush1.bf16.msra.mxu0 %v3355_v3  ;;  %v3904_v3 = vld [vmem:[#allocation4 + $0x3e4] ss:$16 sps:$4 sm:$0xff]  }
  0x68   :  { %2505 = vmatprep.subr.bf16.mxu0 %v3814_v2  ;;  %585 = vmatpush1.bf16.msra.mxu1 %v3357_v5  ;;  %v3902_v2 = vld [vmem:[#allocation4 + $0x3e0] ss:$16 sps:$4 sm:$0xff]   ;;  %v3910_v5 = vld [vmem:[#allocation4 + $0xc] ss:$16 sps:$4 sm:$0xff]  }
  0x69   :  { %2464 = vmatprep.subr.bf16.mxu1 %v3811_v4  ;;  %v3907_v4 = vld [vmem:[#allocation4 + $0x404] ss:$16 sps:$4 sm:$0xff]  }
  0x6a   :  { %562 = vmatmul.mubr.bf16.vlgmr.msra.gmra.mrb[4].mxu0 %v4379_v13 }
  0x6b   :  { %2506 = vmatpush1.bf16.msra.mxu0 %v3812_v6  ;;  %603 = vmatmul.mubr.bf16.vlgmr.msra.gmra.mrb[4].mxu1 %v4379_v13  ;;  %v3827_v13 = vld [vmem:[#allocation4 + $0x60] ss:$16 sps:$4 sm:$0xff]  }
  0x6c   :  { %2465 = vmatpush1.bf16.msra.mxu1 %v3809_v7  ;;  %2507 = vmatprep.subr.bf16.mxu0 %v3820_v9 }
  0x6d   :  { %2466 = vmatprep.subr.bf16.mxu1 %v3817_v8 }
  0x6f   :  { %2508 = vmatpush1.bf16.msra.mxu0 %v3818_v11 }
  0x70   :  { %2467 = vmatpush1.bf16.msra.mxu1 %v3815_v10  ;;  %2509 = vmatprep.subr.bf16.mxu0 %v3826_v14 }
  0x71   :  { %2468 = vmatprep.subr.bf16.mxu1 %v3823_v12 }
  0x73   :  { %2510 = vmatpush1.bf16.msra.mxu0 %v3824_v16 }
  0x74   :  { %2469 = vmatpush1.bf16.msra.mxu1 %v3821_v15  ;;  %2511 = vmatprep.subr.bf16.mxu0 %v3832_v18 }
  0x75   :  { %2470 = vmatprep.subr.bf16.mxu1 %v3829_v17 }
  0x77   :  { %2512 = vmatpush1.bf16.msra.mxu0 %v3830_v19 }
  0x78   :  { %2471 = vmatpush1.bf16.msra.mxu1 %v3827_v13  ;;  %2513 = vmatprep.subr.bf16.mxu0 %v3838_v21 }
  0x79   :  { %2472 = vmatprep.subr.bf16.mxu1 %v3835_v20 }
  0x7b   :  { %2514 = vmatpush1.bf16.msra.mxu0 %v3836_v23 }
  0x7c   :  { %2473 = vmatpush1.bf16.msra.mxu1 %v3833_v22  ;;  %2515 = vmatprep.subr.bf16.mxu0 %v3844_v25 }
  0x7d   :  { %2474 = vmatprep.subr.bf16.mxu1 %v3841_v24 }
  0x7f   :  { %2516 = vmatpush1.bf16.msra.mxu0 %v3842_v27 }
  0x80   :  { %2475 = vmatpush1.bf16.msra.mxu1 %v3839_v26  ;;  %2517 = vmatprep.subr.bf16.mxu0 %v3850_v29 }
  0x81   :  { %2476 = vmatprep.subr.bf16.mxu1 %v3847_v28 }
  0x83   :  { %2518 = vmatpush1.bf16.msra.mxu0 %v3848_v31 }
  0x84   :  { %2477 = vmatpush1.bf16.msra.mxu1 %v3845_v30  ;;  %2519 = vmatprep.subr.bf16.mxu0 %v3856_v33 }
  0x85   :  { %2478 = vmatprep.subr.bf16.mxu1 %v3853_v32 }
  0x87   :  { %2520 = vmatpush1.bf16.msra.mxu0 %v3854_v35 }
  0x88   :  { %2479 = vmatpush1.bf16.msra.mxu1 %v3851_v34  ;;  %2521 = vmatprep.subr.bf16.mxu0 %v3862_v37 }
  0x89   :  { %2480 = vmatprep.subr.bf16.mxu1 %v3859_v36 }
  0x8b   :  { %2522 = vmatpush1.bf16.msra.mxu0 %v3860_v39 }
  0x8c   :  { %2481 = vmatpush1.bf16.msra.mxu1 %v3857_v38  ;;  %2523 = vmatprep.subr.bf16.mxu0 %v3868_v0 }
  0x8d   :  { %2482 = vmatprep.subr.bf16.mxu1 %v3865_v40 }
  0x8f   :  { %2524 = vmatpush1.bf16.msra.mxu0 %v3866_v42 }
  0x90   :  { %2483 = vmatpush1.bf16.msra.mxu1 %v3863_v41  ;;  %2525 = vmatprep.subr.bf16.mxu0 %v3874_v44 }
  0x91   :  { %2484 = vmatprep.subr.bf16.mxu1 %v3871_v43 }
  0x93   :  { %2526 = vmatpush1.bf16.msra.mxu0 %v3872_v46 }
  0x94   :  { %2485 = vmatpush1.bf16.msra.mxu1 %v3869_v45  ;;  %2527 = vmatprep.subr.bf16.mxu0 %v3880_v48 }
  0x95   :  { %2486 = vmatprep.subr.bf16.mxu1 %v3877_v47 }
  0x97   :  { %2528 = vmatpush1.bf16.msra.mxu0 %v3878_v50 }
  0x98   :  { %2487 = vmatpush1.bf16.msra.mxu1 %v3875_v49  ;;  %2529 = vmatprep.subr.bf16.mxu0 %v3886_v52 }
  0x99   :  { %2488 = vmatprep.subr.bf16.mxu1 %v3883_v51 }
  0x9b   :  { %2530 = vmatpush1.bf16.msra.mxu0 %v3884_v54 }
  0x9c   :  { %2489 = vmatpush1.bf16.msra.mxu1 %v3881_v53  ;;  %2531 = vmatprep.subr.bf16.mxu0 %v3892_v56 }
  0x9d   :  { %2490 = vmatprep.subr.bf16.mxu1 %v3889_v55 }
  0x9f   :  { %2532 = vmatpush1.bf16.msra.mxu0 %v3890_v58 }
  0xa0   :  { %2491 = vmatpush1.bf16.msra.mxu1 %v3887_v57  ;;  %2533 = vmatprep.subr.bf16.mxu0 %v3898_v60 }
  0xa1   :  { %2492 = vmatprep.subr.bf16.mxu1 %v3895_v59 }
  0xa3   :  { %2534 = vmatpush1.bf16.msra.mxu0 %v3896_v62 }
  0xa4   :  { %2493 = vmatpush1.bf16.msra.mxu1 %v3893_v61  ;;  %2535 = vmatprep.subr.bf16.mxu0 %v3904_v3 }
  0xa5   :  { %2494 = vmatprep.subr.bf16.mxu1 %v3901_v1 }
  0xa7   :  { %2536 = vmatpush1.bf16.msra.mxu0 %v3902_v2 }
  0xa8   :  { %2495 = vmatpush1.bf16.msra.mxu1 %v3899_v63  ;;  %2546 = vmatprep.subr.bf16.mxu0 %v3907_v4 }
  0xa9   :  { %2628 = vmatprep.subr.bf16.mxu1 %v3910_v5 }
 0x11d   :  { %v481_v6 = vpop.f32.mrb[0].mxu0  ;;  %v522_v8 = vpop.f32.mrb[0].mxu1 }
 0x11e   :  { %v611_v7 = vrot.slane %v481_v6, 4  ;;  %v483_v9 = vpop.f32.mrb[1].mxu0  ;;  %v623_v10 = vrot.slane %v522_v8, 4  ;;  %v524_v12 = vpop.f32.mrb[1].mxu1 }
 0x11f   :  { %v617_v11 = vrot.slane %v483_v9, 4  ;;  %v485_v14 = vpop.f32.mrb[2].mxu0  ;;  %v629_v16 = vrot.slane %v524_v12, 4  ;;  %v526_v18 = vpop.f32.mrb[2].mxu1 }
 0x120   :  { %v612_v15 = vadd.f32 %v611_v7, %v481_v6  ;;  %v486_v17 = vpop.f32.mrb[3].mxu0  ;;  %v624_v13 = vadd.f32 %v623_v10, %v522_v8  ;;  %v527_v20 = vpop.f32.mrb[3].mxu1 }
 0x121   :  { %v618_v19 = vadd.f32 %v617_v11, %v483_v9  ;;  %v630_v22 = vadd.f32 %v629_v16, %v524_v12 }
 0x122   :  { %v613_v21 = vrot.slane %v612_v15, 2  ;;  %v625_v23 = vrot.slane %v624_v13, 2 }
 0x123   :  { %v619_v24 = vrot.slane %v618_v19, 2  ;;  %v631_v26 = vrot.slane %v630_v22, 2 }
 0x124   :  { %v614_v25 = vadd.f32 %v613_v21, %v612_v15  ;;  %v626_v27 = vadd.f32 %v625_v23, %v624_v13 }
 0x125   :  { %v620_v28 = vadd.f32 %v619_v24, %v618_v19  ;;  %v632_v30 = vadd.f32 %v631_v26, %v630_v22 }
 0x126   :  { %v615_v29 = vrot.slane %v614_v25, 1  ;;  %v627_v31 = vrot.slane %v626_v27, 1 }
 0x127   :  { %v621_v32 = vrot.slane %v620_v28, 1  ;;  %v633_v34 = vrot.slane %v632_v30, 1 }
 0x128   :  { %v616_v33 = vadd.f32 %v615_v29, %v614_v25  ;;  %v628_v35 = vadd.f32 %v627_v31, %v626_v27 }
 0x129   :  { %v622_v36 = vadd.f32 %v621_v32, %v620_v28  ;;  %v634_v38 = vadd.f32 %v633_v34, %v632_v30 }
 0x12a   :  { %v660_v37 = vmul.f32 0.125, %v616_v33  ;;  %v662_v39 = vmul.f32 0.125, %v628_v35 }
 0x12b   :  { %v661_v40 = vmul.f32 0.125, %v622_v36  ;;  %v663_v41 = vmul.f32 0.125, %v634_v38  ;;  %v4413_v36 = vld [vmem:[%s4669_s2] sm:$0xff] }
 0x12c   :  { %v4387_v0 = vsub.f32 %v481_v6, %v660_v37  ;;  %v4389_v42 = vsub.f32 %v522_v8, %v662_v39  ;;  %v758_v6 = vlaneseq }
 0x12d   :  { %v4391_v43 = vsub.f32 %v483_v9, %v661_v40  ;;  %v4395_v45 = vsub.f32 %v524_v12, %v663_v41 }
 0x12e   :  { %v676_v44 = vmul.f32 %v4387_v0, %v4387_v0  ;;  %v678_v46 = vmul.f32 %v4389_v42, %v4389_v42  ;;  %v4403_v17 = vshrl.u32 %v758_v6, 7 }
 0x12f   :  { %v677_v47 = vmul.f32 %v4391_v43, %v4391_v43  ;;  %v679_v49 = vmul.f32 %v4395_v45, %v4395_v45 }
 0x130   :  { %v684_v48 = vrot.slane %v676_v44, 4  ;;  %v696_v50 = vrot.slane %v678_v46, 4  ;;  %v4408_v32 = vsub.s32 0, %v4403_v17  ;;  %v768_v37 = vsub.s32 2, %v4403_v17 }
 0x131   :  { %v690_v51 = vrot.slane %v677_v47, 4  ;;  %v702_v53 = vrot.slane %v679_v49, 4  ;;  %v764_v40 = vsub.s32 1, %v4403_v17 }
 0x132   :  { %v685_v52 = vadd.f32 %v684_v48, %v676_v44  ;;  %v697_v54 = vadd.f32 %v696_v50, %v678_v46  ;;  %v772_v46 = vsub.s32 3, %v4403_v17  ;;  %v761_v48 = vrot.slane %v4413_v36, %v4408_v32 }
 0x133   :  { %v691_v55 = vadd.f32 %v690_v51, %v677_v47  ;;  %v703_v57 = vadd.f32 %v702_v53, %v679_v49  ;;  %v769_v51 = vrot.slane %v4413_v36, %v768_v37  ;;  %v4424_v53 = vld [vmem:[%s4670_s3] sm:$0xff] }
 0x134   :  { %v686_v56 = vrot.slane %v685_v52, 2  ;;  %v698_v58 = vrot.slane %v697_v54, 2 }
 0x135   :  { %v692_v59 = vrot.slane %v691_v55, 2  ;;  %v704_v61 = vrot.slane %v703_v57, 2 }
 0x136   :  { %v687_v60 = vadd.f32 %v686_v56, %v685_v52  ;;  %v699_v62 = vadd.f32 %v698_v58, %v697_v54  ;;  %v765_v54 = vrot.slane %v4413_v36, %v764_v40  ;;  %v773_v58 = vrot.slane %v4413_v36, %v772_v46 }
 0x137   :  { %v693_v63 = vadd.f32 %v692_v59, %v691_v55  ;;  %v705_v2 = vadd.f32 %v704_v61, %v703_v57 }
 0x138   :  { %v688_v1 = vrot.slane %v687_v60, 1  ;;  %v700_v3 = vrot.slane %v699_v62, 1 }
 0x139   :  { %v694_v4 = vrot.slane %v693_v63, 1  ;;  %v706_v7 = vrot.slane %v705_v2, 1 }
 0x13a   :  { %v689_v5 = vadd.f32 %v688_v1, %v687_v60  ;;  %v701_v8 = vadd.f32 %v700_v3, %v699_v62 }
 0x13b   :  { %v695_v9 = vadd.f32 %v694_v4, %v693_v63  ;;  %v707_v11 = vadd.f32 %v706_v7, %v705_v2  ;;  %v851_v2 = vrot.slane %v4424_v53, %v4408_v32 }
 0x13c   :  { %v732_v10 = vmul.f32 0.125, %v689_v5  ;;  %v734_v12 = vmul.f32 0.125, %v701_v8 }
 0x13d   :  { %v733_v14 = vmul.f32 0.125, %v695_v9  ;;  %v563_v15 = vpop.f32.mrb[4].mxu0  ;;  %v735_v18 = vmul.f32 0.125, %v707_v11  ;;  %v859_v11 = vrot.slane %v4424_v53, %v768_v37 }
 0x13e   :  { %v740_v16 = vadd.f32 1e-05, %v732_v10  ;;  %v635_v13 = vrot.slane %v563_v15, 4  ;;  %v565_v19 = vpop.f32.mrb[5].mxu0  ;;  %v742_v20 = vadd.f32 1e-05, %v734_v12 }
 0x13f   :  { %v741_v21 = vadd.f32 1e-05, %v733_v14  ;;  %v641_v22 = vrot.slane %v565_v19, 4  ;;  %v4405_v23 = vpop.f32.mrb[4].mxu1  ;;  %v743_v24 = vadd.f32 1e-05, %v735_v18  ;;  %v855_v18 = vrot.slane %v4424_v53, %v764_v40 }
 0x140   :  { %4225 = vrsqrt.f32 %v740_v16  ;;  %v636_v25 = vadd.f32 %v635_v13, %v563_v15  ;;  %v606_v26 = vpop.f32.mrb[5].mxu1  ;;  %v567_v29 = vpop.f32.mrb[6].mxu0 }
 0x141   :  { %4227 = vrsqrt.f32 %v742_v20  ;;  %v642_v27 = vadd.f32 %v641_v22, %v565_v19  ;;  %v653_v28 = vrot.slane %v606_v26, 4  ;;  %v568_v31 = vpop.f32.mrb[7].mxu0  ;;  %v608_v35 = vpop.f32.mrb[6].mxu1 }
 0x142   :  { %4229 = vrsqrt.f32 %v741_v21  ;;  %v637_v30 = vrot.slane %v636_v25, 2  ;;  %v609_v39 = vpop.f32.mrb[7].mxu1  ;;  %v863_v21 = vrot.slane %v4424_v53, %v772_v46 }
 0x143   :  { %4231 = vrsqrt.f32 %v743_v24  ;;  %v643_v33 = vrot.slane %v642_v27, 2  ;;  %v654_v34 = vadd.f32 %v653_v28, %v606_v26 }
 0x144   :  { %v638_v38 = vadd.f32 %v637_v30, %v636_v25 }
 0x145   :  { %v644_v41 = vadd.f32 %v643_v33, %v642_v27  ;;  %v655_v44 = vrot.slane %v654_v34, 2 }
 0x146   :  { %v639_v47 = vrot.slane %v638_v38, 1 }
 0x147   :  { %v645_v49 = vrot.slane %v644_v41, 1  ;;  %v656_v50 = vadd.f32 %v655_v44, %v654_v34 }
 0x148   :  { %v640_v52 = vadd.f32 %v639_v47, %v638_v38  ;;  %v3908_v47 = vld [vmem:[#allocation4 + $0x8] ss:$16 sps:$4 sm:$0xff]  }
 0x149   :  { %v646_v55 = vadd.f32 %v645_v49, %v644_v41  ;;  %v657_v56 = vrot.slane %v656_v50, 1 }
 0x14a   :  { %v4226_v57 = vpop.eup %4225  ;;  %v664_v59 = vmul.f32 0.125, %v640_v52 }
 0x14b   :  { %v4228_v60 = vpop.eup %4227  ;;  %v798_v61 = vmul.f32 %v4226_v57, %v761_v48  ;;  %v665_v62 = vmul.f32 0.125, %v646_v55  ;;  %v658_v63 = vadd.f32 %v657_v56, %v656_v50  ;;  %v3913_v55 = vld [vmem:[#allocation4 + $0x424] ss:$16 sps:$4 sm:$0xff]   ;;  %v3916_v56 = vld [vmem:[#allocation4 + $0x2c] ss:$16 sps:$4 sm:$0xff]  }
 0x14c   :  { %v4230_v1 = vpop.eup %4229  ;;  %v800_v3 = vmul.f32 %v4228_v60, %v769_v51  ;;  %v4430_v4 = vsub.f32 %v563_v15, %v664_v59  ;;  %v3905_v51 = vld [vmem:[#allocation4 + $0x400] ss:$16 sps:$4 sm:$0xff]   ;;  %v3914_v60 = vld [vmem:[#allocation4 + $0x28] ss:$16 sps:$4 sm:$0xff]  }
 0x14d   :  { %v4232_v5 = vpop.eup %4231  ;;  %v809_v6 = vrot.slane %v798_v61, %v4408_v32  ;;  %v799_v7 = vmul.f32 %v4230_v1, %v765_v54  ;;  %v4433_v8 = vsub.f32 %v565_v19, %v665_v62  ;;  %v667_v9 = vmul.f32 0.125, %v658_v63  ;;  %v3911_v61 = vld [vmem:[#allocation4 + $0x420] ss:$16 sps:$4 sm:$0xff]   ;;  %v3922_v63 = vld [vmem:[#allocation4 + $0x4c] ss:$16 sps:$4 sm:$0xff]  }
 0x14e   :  { %v817_v10 = vrot.slane %v800_v3, %v4408_v32  ;;  %v801_v12 = vmul.f32 %v4232_v5, %v773_v58  ;;  %v680_v14 = vmul.f32 %v4430_v4, %v4430_v4  ;;  %v3919_v1 = vld [vmem:[#allocation4 + $0x444] ss:$16 sps:$4 sm:$0xff]  }
 0x14f   :  { %v838_v16 = vmul.f32 %v809_v6, %v4387_v0  ;;  %v813_v15 = vrot.slane %v799_v7, %v4408_v32  ;;  %v681_v13 = vmul.f32 %v4433_v8, %v4433_v8  ;;  %v4447_v22 = vsub.f32 %v606_v26, %v667_v9  ;;  %v3920_v6 = vld [vmem:[#allocation4 + $0x48] ss:$16 sps:$4 sm:$0xff]   ;;  %v3917_v7 = vld [vmem:[#allocation4 + $0x440] ss:$16 sps:$4 sm:$0xff]   ;;  %v3928_v9 = vld [vmem:[#allocation4 + $0x6c] ss:$16 sps:$4 sm:$0xff]  }
 0x150   :  { %v840_v19 = vmul.f32 %v817_v10, %v4389_v42  ;;  %v821_v20 = vrot.slane %v801_v12, %v4408_v32  ;;  %v708_v29 = vrot.slane %v680_v14, 4  ;;  %v3925_v10 = vld [vmem:[#allocation4 + $0x464] ss:$16 sps:$4 sm:$0xff]  }
 0x151   :  { %v888_v24 = vadd.f32 %v851_v2, %v838_v16  ;;  %v839_v25 = vmul.f32 %v813_v15, %v4391_v43  ;;  %v714_v27 = vrot.slane %v681_v13, 4  ;;  %v683_v35 = vmul.f32 %v4447_v22, %v4447_v22  ;;  %v3923_v15 = vld [vmem:[#allocation4 + $0x460] ss:$16 sps:$4 sm:$0xff]  }
 0x152   :  { %v890_v0 = vadd.f32 %v859_v11, %v840_v19  ;;  %v841_v28 = vmul.f32 %v821_v20, %v4395_v45  ;;  %v709_v45 = vadd.f32 %v708_v29, %v680_v14  ;;  %v3926_v14 = vld [vmem:[#allocation4 + $0x68] ss:$16 sps:$4 sm:$0xff]   ;;  %v780_v16 = vsub.s32 5, %v4403_v17 }
 0x153   :  { %v904_v30 = vmul.f32 0.02, %v888_v24  ;;  %v889_v31 = vadd.f32 %v855_v18, %v839_v25  ;;  %vm896_vm0 = vcmp.ge.f32.partialorder %v888_v24, 0.0  ;;  %v715_v33 = vadd.f32 %v714_v27, %v681_v13  ;;  %v3934_v18 = vld [vmem:[#allocation4 + $0x8c] ss:$16 sps:$4 sm:$0xff]  }
 0x154   :  { %v906_v34 = vmul.f32 0.02, %v890_v0  ;;  %v891_v42 = vadd.f32 %v863_v21, %v841_v28  ;;  %vm898_vm1 = vcmp.ge.f32.partialorder %v890_v0, 0.0  ;;  %v726_v49 = vrot.slane %v683_v35, 4  ;;  %v3931_v13 = vld [vmem:[#allocation4 + $0x484] ss:$16 sps:$4 sm:$0xff]  }
 0x155   :  { %vm897_vm2 = vcmp.ge.f32.partialorder %v889_v31, 0.0  ;;  %v905_v26 = vmul.f32 0.02, %v889_v31  ;;  %v716_v37 = vrot.slane %v715_v33, 2  ;;  %v912_v38 = vsel %vm896_vm0, %v888_v24, %v904_v30  ;;  %v3932_v21 = vld [vmem:[#allocation4 + $0x88] ss:$16 sps:$4 sm:$0xff]  }
 0x156   :  { %vm899_vm3 = vcmp.ge.f32.partialorder %v891_v42, 0.0  ;;  %v907_v43 = vmul.f32 0.02, %v891_v42  ;;  %v914_v39 = vsel %vm898_vm1, %v890_v0, %v906_v34  ;;  %v4457_v52 = vpack.c.bf16 %v912_v38, %v912_v38  ;;  %v3929_v25 = vld [vmem:[#allocation4 + $0x480] ss:$16 sps:$4 sm:$0xff]  }
 0x157   :  { %v913_v40 = vsel %vm897_vm2, %v889_v31, %v905_v26  ;;  %v717_v41 = vadd.f32 %v716_v37, %v715_v33  ;;  %v4453_v48 = vpack.c.bf16 %v914_v39, %v914_v39  ;;  %v727_v58 = vadd.f32 %v726_v49, %v683_v35  ;;  %v3940_v27 = vld [vmem:[#allocation4 + $0xac] ss:$16 sps:$4 sm:$0xff]   ;;  %v3937_v0 = vld [vmem:[#allocation4 + $0x4a4] ss:$16 sps:$4 sm:$0xff]   ;;  %v3938_v31 = vld [vmem:[#allocation4 + $0xa8] ss:$16 sps:$4 sm:$0xff]  }
 0x158   :  { %v921_v44 = vpack.c.bf16 %v913_v40, %v913_v40  ;;  %v915_v46 = vsel %vm899_vm3, %v891_v42, %v907_v43  ;;  %v710_v59 = vrot.slane %v709_v45, 2  ;;  %v781_v24 = vrot.slane %v4413_v36, %v780_v16  ;;  %v3935_v34 = vld [vmem:[#allocation4 + $0x4a0] ss:$16 sps:$4 sm:$0xff]   ;;  %v3946_v42 = vld [vmem:[#allocation4 + $0xcc] ss:$16 sps:$4 sm:$0xff]  }
 0x159   :  { %v4455_v50 = vpack.c.bf16 %v915_v46, %v915_v46  ;;  %v718_v54 = vrot.slane %v717_v41, 1  ;;  %v728_v3 = vrot.slane %v727_v58, 2  ;;  %v3943_v35 = vld [vmem:[#allocation4 + $0x4c4] ss:$16 sps:$4 sm:$0xff]   ;;  %v871_v37 = vrot.slane %v4424_v53, %v780_v16  ;;  %v3944_v39 = vld [vmem:[#allocation4 + $0xc8] ss:$16 sps:$4 sm:$0xff]  }
 0x15a   :  { %2496 = vmatprep.mubr.bf16.mxu1 %v921_v44  ;;  %v711_v5 = vadd.f32 %v710_v59, %v709_v45  ;;  %v647_v40 = vrot.slane %v4405_v23, 4  ;;  %v3949_v46 = vld [vmem:[#allocation4 + $0x4e4] ss:$16 sps:$4 sm:$0xff]   ;;  %v3956_v59 = vld [vmem:[#allocation4 + $0x108] ss:$16 sps:$4 sm:$0xff]  }
 0x15b   :  { %2537 = vmatprep.mubr.bf16.mxu0 %v4455_v50  ;;  %2497 = vmatmul.mubr.bf16.vlgmr.msra.gmra.mrb[8].mxu1 %v4457_v52  ;;  %v719_v57 = vadd.f32 %v718_v54, %v717_v41  ;;  %v729_v11 = vadd.f32 %v728_v3, %v727_v58  ;;  %v3941_v41 = vld [vmem:[#allocation4 + $0x4c0] ss:$16 sps:$4 sm:$0xff]   ;;  %v3950_v54 = vld [vmem:[#allocation4 + $0xe8] ss:$16 sps:$4 sm:$0xff]  }
 0x15c   :  { %2538 = vmatmul.mubr.bf16.vlgmr.msra.gmra.mrb[8].mxu0 %v4453_v48  ;;  %2629 = vmatpush1.bf16.msra.mxu1 %v3908_v47  ;;  %v712_v12 = vrot.slane %v711_v5, 1  ;;  %v3962_v3 = vld [vmem:[#allocation4 + $0x128] ss:$16 sps:$4 sm:$0xff]  }
 0x15d   :  { %2547 = vmatpush1.bf16.msra.mxu0 %v3905_v51  ;;  %2660 = vmatprep.mubr.bf16.mxu1 %v921_v44  ;;  %v737_v62 = vmul.f32 0.125, %v719_v57  ;;  %v730_v19 = vrot.slane %v729_v11, 1  ;;  %v3952_v44 = vld [vmem:[#allocation4 + $0xec] ss:$16 sps:$4 sm:$0xff]   ;;  %v3947_v51 = vld [vmem:[#allocation4 + $0x4e0] ss:$16 sps:$4 sm:$0xff]  }
 0x15e   :  { %2548 = vmatprep.subr.bf16.mxu0 %v3913_v55  ;;  %2630 = vmatprep.subr.bf16.mxu1 %v3916_v56  ;;  %v713_v20 = vadd.f32 %v712_v12, %v711_v5  ;;  %v648_v55 = vadd.f32 %v647_v40, %v4405_v23  ;;  %v3958_v56 = vld [vmem:[#allocation4 + $0x10c] ss:$16 sps:$4 sm:$0xff]   ;;  %v3967_v12 = vld [vmem:[#allocation4 + $0x544] ss:$16 sps:$4 sm:$0xff]  }
 0x15f   :  { %v745_v2 = vadd.f32 1e-05, %v737_v62  ;;  %v731_v28 = vadd.f32 %v730_v19, %v729_v11  ;;  %v776_v62 = vsub.s32 4, %v4403_v17  ;;  %v3965_v19 = vld [vmem:[#allocation4 + $0x540] ss:$16 sps:$4 sm:$0xff]  }
 0x160   :  { %2631 = vmatpush1.bf16.msra.mxu1 %v3914_v60  ;;  %v736_v30 = vmul.f32 0.125, %v713_v20  ;;  %v3976_v20 = vld [vmem:[#allocation4 + $0x16c] ss:$16 sps:$4 sm:$0xff]  }
 0x161   :  { %2549 = vmatpush1.bf16.msra.mxu0 %v3911_v61  ;;  %2632 = vmatprep.subr.bf16.mxu1 %v3922_v63  ;;  %4233 = vrsqrt.f32 %v745_v2  ;;  %v739_v43 = vmul.f32 0.125, %v731_v28  ;;  %v649_v61 = vrot.slane %v648_v55, 2  ;;  %v3953_v63 = vld [vmem:[#allocation4 + $0x500] ss:$16 sps:$4 sm:$0xff]   ;;  %v3961_v2 = vld [vmem:[#allocation4 + $0x524] ss:$16 sps:$4 sm:$0xff]  }
 0x162   :  { %2550 = vmatprep.subr.bf16.mxu0 %v3919_v1  ;;  %v744_v38 = vadd.f32 1e-05, %v736_v30  ;;  %v3964_v1 = vld [vmem:[#allocation4 + $0x12c] ss:$16 sps:$4 sm:$0xff]   ;;  %v3971_v28 = vld [vmem:[#allocation4 + $0x560] ss:$16 sps:$4 sm:$0xff]  }
 0x163   :  { %v747_v49 = vadd.f32 1e-05, %v739_v43  ;;  %v650_v5 = vadd.f32 %v649_v61, %v648_v55  ;;  %v3979_v30 = vld [vmem:[#allocation4 + $0x584] ss:$16 sps:$4 sm:$0xff]  }
 0x164   :  { %2633 = vmatpush1.bf16.msra.mxu1 %v3920_v6  ;;  %4235 = vrsqrt.f32 %v744_v38  ;;  %v788_v6 = vsub.s32 7, %v4403_v17  ;;  %v3985_v43 = vld [vmem:[#allocation4 + $0x5a4] ss:$16 sps:$4 sm:$0xff]   ;;  %v3986_v38 = vld [vmem:[#allocation4 + $0x1a8] ss:$16 sps:$4 sm:$0xff]  }
 0x165   :  { %2551 = vmatpush1.bf16.msra.mxu0 %v3917_v7  ;;  %2634 = vmatprep.subr.bf16.mxu1 %v3928_v9  ;;  %4237 = vrsqrt.f32 %v747_v49  ;;  %v777_v7 = vrot.slane %v4413_v36, %v776_v62  ;;  %v3959_v9 = vld [vmem:[#allocation4 + $0x520] ss:$16 sps:$4 sm:$0xff]   ;;  %v651_v16 = vrot.slane %v650_v5, 1  ;;  %v3997_v55 = vld [vmem:[#allocation4 + $0x5e4] ss:$16 sps:$4 sm:$0xff]  }
 0x166   :  { %2552 = vmatprep.subr.bf16.mxu0 %v3925_v10  ;;  %v3970_v10 = vld [vmem:[#allocation4 + $0x14c] ss:$16 sps:$4 sm:$0xff]  }
 0x168   :  { %2635 = vmatpush1.bf16.msra.mxu1 %v3926_v14  ;;  %v3968_v14 = vld [vmem:[#allocation4 + $0x148] ss:$16 sps:$4 sm:$0xff]  }
 0x169   :  { %2553 = vmatpush1.bf16.msra.mxu0 %v3923_v15  ;;  %2636 = vmatprep.subr.bf16.mxu1 %v3934_v18  ;;  %v789_v15 = vrot.slane %v4413_v36, %v788_v6 }
 0x16a   :  { %2554 = vmatprep.subr.bf16.mxu0 %v3931_v13 }
 0x16b   :  { %v4234_v29 = vpop.eup %4233 }
 0x16c   :  { %2637 = vmatpush1.bf16.msra.mxu1 %v3932_v21  ;;  %v803_v33 = vmul.f32 %v4234_v29, %v781_v24  ;;  %v3973_v21 = vld [vmem:[#allocation4 + $0x564] ss:$16 sps:$4 sm:$0xff]   ;;  %v3974_v24 = vld [vmem:[#allocation4 + $0x168] ss:$16 sps:$4 sm:$0xff]   ;;  %v3982_v29 = vld [vmem:[#allocation4 + $0x18c] ss:$16 sps:$4 sm:$0xff]  }
 0x16d   :  { %2555 = vmatpush1.bf16.msra.mxu0 %v3929_v25  ;;  %2638 = vmatprep.subr.bf16.mxu1 %v3940_v27  ;;  %v652_v25 = vadd.f32 %v651_v16, %v650_v5  ;;  %v4001_v5 = vld [vmem:[#allocation4 + $0x600] ss:$16 sps:$4 sm:$0xff]   ;;  %v4015_v16 = vld [vmem:[#allocation4 + $0x644] ss:$16 sps:$4 sm:$0xff]  }
 0x16e   :  { %2556 = vmatprep.subr.bf16.mxu0 %v3937_v0  ;;  %v829_v26 = vrot.slane %v803_v33, %v4408_v32  ;;  %v4236_v11 = vpop.eup %4235 }
 0x16f   :  { %v4238_v18 = vpop.eup %4237  ;;  %v802_v13 = vmul.f32 %v4236_v11, %v777_v7  ;;  %v666_v33 = vmul.f32 0.125, %v652_v25  ;;  %v4009_v7 = vld [vmem:[#allocation4 + $0x624] ss:$16 sps:$4 sm:$0xff]   ;;  %v4010_v11 = vld [vmem:[#allocation4 + $0x228] ss:$16 sps:$4 sm:$0xff]  }
 0x170   :  { %2639 = vmatpush1.bf16.msra.mxu1 %v3938_v31  ;;  %v843_v45 = vmul.f32 %v829_v26, %v4433_v8  ;;  %v3955_v8 = vld [vmem:[#allocation4 + $0x504] ss:$16 sps:$4 sm:$0xff]   ;;  %v805_v27 = vmul.f32 %v4238_v18, %v789_v15  ;;  %v3980_v31 = vld [vmem:[#allocation4 + $0x188] ss:$16 sps:$4 sm:$0xff]   ;;  %v3977_v26 = vld [vmem:[#allocation4 + $0x580] ss:$16 sps:$4 sm:$0xff]  }
 0x171   :  { %2557 = vmatpush1.bf16.msra.mxu0 %v3935_v34  ;;  %2640 = vmatprep.subr.bf16.mxu1 %v3946_v42  ;;  %v825_v0 = vrot.slane %v802_v13, %v4408_v32  ;;  %v4013_v18 = vld [vmem:[#allocation4 + $0x640] ss:$16 sps:$4 sm:$0xff]   ;;  %v4024_v13 = vld [vmem:[#allocation4 + $0x26c] ss:$16 sps:$4 sm:$0xff]  }
 0x172   :  { %2558 = vmatprep.subr.bf16.mxu0 %v3943_v35  ;;  %v893_v47 = vadd.f32 %v871_v37, %v843_v45  ;;  %v837_v34 = vrot.slane %v805_v27, %v4408_v32  ;;  %v867_v35 = vrot.slane %v4424_v53, %v776_v62  ;;  %v3988_v37 = vld [vmem:[#allocation4 + $0x1ac] ss:$16 sps:$4 sm:$0xff]   ;;  %v879_v45 = vrot.slane %v4424_v53, %v788_v6  ;;  %v4003_v62 = vld [vmem:[#allocation4 + $0x604] ss:$16 sps:$4 sm:$0xff]  }
 0x173   :  { %v842_v42 = vmul.f32 %v825_v0, %v4430_v4  ;;  %v3983_v4 = vld [vmem:[#allocation4 + $0x5a0] ss:$16 sps:$4 sm:$0xff]   ;;  %v4012_v6 = vld [vmem:[#allocation4 + $0x22c] ss:$16 sps:$4 sm:$0xff]   ;;  %v4028_v0 = vld [vmem:[#allocation4 + $0x288] ss:$16 sps:$4 sm:$0xff]  }
 0x174   :  { %2641 = vmatpush1.bf16.msra.mxu1 %v3944_v39  ;;  %vm901_vm4 = vcmp.ge.f32.partialorder %v893_v47, 0.0  ;;  %v909_v57 = vmul.f32 0.02, %v893_v47  ;;  %v4481_v39 = vsub.f32 %v4405_v23, %v666_v33  ;;  %v845_v40 = vmul.f32 %v837_v34, %v4447_v22  ;;  %v3989_v23 = vld [vmem:[#allocation4 + $0x5c0] ss:$16 sps:$4 sm:$0xff]  }
 0x175   :  { %2559 = vmatpush1.bf16.msra.mxu0 %v3941_v41  ;;  %2642 = vmatprep.subr.bf16.mxu1 %v3952_v44  ;;  %v892_v41 = vadd.f32 %v867_v35, %v842_v42  ;;  %v3994_v44 = vld [vmem:[#allocation4 + $0x1cc] ss:$16 sps:$4 sm:$0xff]   ;;  %v4034_v33 = vld [vmem:[#allocation4 + $0x2a8] ss:$16 sps:$4 sm:$0xff]   ;;  %v4031_v34 = vld [vmem:[#allocation4 + $0x6a0] ss:$16 sps:$4 sm:$0xff]  }
 0x176   :  { %2560 = vmatprep.subr.bf16.mxu0 %v3949_v46  ;;  %v917_v58 = vsel %vm901_vm4, %v893_v47, %v909_v57  ;;  %v3991_v46 = vld [vmem:[#allocation4 + $0x5c4] ss:$16 sps:$4 sm:$0xff]   ;;  %v3992_v47 = vld [vmem:[#allocation4 + $0x1c8] ss:$16 sps:$4 sm:$0xff]   ;;  %v682_v49 = vmul.f32 %v4481_v39, %v4481_v39  ;;  %v4000_v22 = vld [vmem:[#allocation4 + $0x1ec] ss:$16 sps:$4 sm:$0xff]  }
 0x177   :  { %v4469_v60 = vpack.c.bf16 %v917_v58, %v917_v58  ;;  %vm900_vm5 = vcmp.ge.f32.partialorder %v892_v41, 0.0  ;;  %v3995_v58 = vld [vmem:[#allocation4 + $0x5e0] ss:$16 sps:$4 sm:$0xff]   ;;  %v4030_v25 = vld [vmem:[#allocation4 + $0x28c] ss:$16 sps:$4 sm:$0xff]  }
 0x178   :  { %2643 = vmatpush1.bf16.msra.mxu1 %v3950_v54  ;;  %v908_v54 = vmul.f32 0.02, %v892_v41  ;;  %v720_v57 = vrot.slane %v682_v49, 4  ;;  %v4042_v42 = vld [vmem:[#allocation4 + $0x2cc] ss:$16 sps:$4 sm:$0xff]  }
 0x179   :  { %2561 = vmatpush1.bf16.msra.mxu0 %v3947_v51  ;;  %2644 = vmatprep.subr.bf16.mxu1 %v3958_v56  ;;  %v895_v51 = vadd.f32 %v879_v45, %v845_v40  ;;  %v3998_v56 = vld [vmem:[#allocation4 + $0x1e8] ss:$16 sps:$4 sm:$0xff]   ;;  %v4039_v35 = vld [vmem:[#allocation4 + $0x6c4] ss:$16 sps:$4 sm:$0xff]  }
 0x17a   :  { %2562 = vmatprep.subr.bf16.mxu0 %v3955_v8  ;;  %2578 = vmatprep.mubr.bf16.mxu0 %v4469_v60  ;;  %v916_v61 = vsel %vm900_vm5, %v892_v41, %v908_v54  ;;  %v4045_v40 = vld [vmem:[#allocation4 + $0x6e4] ss:$16 sps:$4 sm:$0xff]   ;;  %v4046_v45 = vld [vmem:[#allocation4 + $0x2e8] ss:$16 sps:$4 sm:$0xff]   ;;  %v4043_v41 = vld [vmem:[#allocation4 + $0x6e0] ss:$16 sps:$4 sm:$0xff]  }
 0x17b   :  { %v911_v8 = vmul.f32 0.02, %v895_v51  ;;  %vm903_vm6 = vcmp.ge.f32.partialorder %v895_v51, 0.0  ;;  %v4057_v54 = vld [vmem:[#allocation4 + $0x724] ss:$16 sps:$4 sm:$0xff]  }
 0x17c   :  { %2645 = vmatpush1.bf16.msra.mxu1 %v3956_v59  ;;  %v4006_v59 = vld [vmem:[#allocation4 + $0x20c] ss:$16 sps:$4 sm:$0xff]  }
 0x17d   :  { %2563 = vmatpush1.bf16.msra.mxu0 %v3953_v63  ;;  %2646 = vmatprep.subr.bf16.mxu1 %v3964_v1  ;;  %v4004_v63 = vld [vmem:[#allocation4 + $0x208] ss:$16 sps:$4 sm:$0xff]   ;;  %v4487_v1 = vpack.c.bf16 %v916_v61, %v916_v61  ;;  %v4072_v61 = vld [vmem:[#allocation4 + $0x36c] ss:$16 sps:$4 sm:$0xff]  }
 0x17e   :  { %2564 = vmatprep.subr.bf16.mxu0 %v3961_v2  ;;  %v721_v2 = vadd.f32 %v720_v57, %v682_v49  ;;  %v4049_v49 = vld [vmem:[#allocation4 + $0x700] ss:$16 sps:$4 sm:$0xff]  }
 0x180   :  { %2647 = vmatpush1.bf16.msra.mxu1 %v3962_v3  ;;  %v919_v3 = vsel %vm903_vm6, %v895_v51, %v911_v8  ;;  %v4060_v51 = vld [vmem:[#allocation4 + $0x32c] ss:$16 sps:$4 sm:$0xff]   ;;  %v4063_v8 = vld [vmem:[#allocation4 + $0x744] ss:$16 sps:$4 sm:$0xff]  }
 0x181   :  { %2565 = vmatpush1.bf16.msra.mxu0 %v3959_v9  ;;  %2648 = vmatprep.subr.bf16.mxu1 %v3970_v10  ;;  %v4490_v9 = vpack.c.bf16 %v919_v3, %v919_v3  ;;  %v722_v10 = vrot.slane %v721_v2, 2  ;;  %v4078_v3 = vld [vmem:[#allocation4 + $0x38c] ss:$16 sps:$4 sm:$0xff]  }
 0x182   :  { %2566 = vmatprep.subr.bf16.mxu0 %v3967_v12  ;;  %v4007_v12 = vld [vmem:[#allocation4 + $0x620] ss:$16 sps:$4 sm:$0xff]  }
 0x183   :  { %v723_v15 = vadd.f32 %v722_v10, %v721_v2  ;;  %v4067_v2 = vld [vmem:[#allocation4 + $0x760] ss:$16 sps:$4 sm:$0xff]  }
 0x184   :  { %2649 = vmatpush1.bf16.msra.mxu1 %v3968_v14  ;;  %v4018_v14 = vld [vmem:[#allocation4 + $0x24c] ss:$16 sps:$4 sm:$0xff]  }
 0x185   :  { %2567 = vmatpush1.bf16.msra.mxu0 %v3965_v19  ;;  %2650 = vmatprep.subr.bf16.mxu1 %v3976_v20  ;;  %v4021_v19 = vld [vmem:[#allocation4 + $0x664] ss:$16 sps:$4 sm:$0xff]   ;;  %v724_v20 = vrot.slane %v723_v15, 1 }
 0x186   :  { %2568 = vmatprep.subr.bf16.mxu0 %v3973_v21  ;;  %v4022_v21 = vld [vmem:[#allocation4 + $0x268] ss:$16 sps:$4 sm:$0xff]  }
 0x187   :  { %v725_v27 = vadd.f32 %v724_v20, %v723_v15  ;;  %v4096_v20 = vld [vmem:[#allocation4 + $0x3ec] ss:$16 sps:$4 sm:$0xff]  }
 0x188   :  { %2651 = vmatpush1.bf16.msra.mxu1 %v3974_v24  ;;  %v4019_v24 = vld [vmem:[#allocation4 + $0x660] ss:$16 sps:$4 sm:$0xff]  }
 0x189   :  { %2569 = vmatpush1.bf16.msra.mxu0 %v3971_v28  ;;  %2652 = vmatprep.subr.bf16.mxu1 %v3982_v29  ;;  %v4025_v28 = vld [vmem:[#allocation4 + $0x680] ss:$16 sps:$4 sm:$0xff]   ;;  %v4036_v29 = vld [vmem:[#allocation4 + $0x2ac] ss:$16 sps:$4 sm:$0xff]  }
 0x18a   :  { %2570 = vmatprep.subr.bf16.mxu0 %v3979_v30  ;;  %v4033_v30 = vld [vmem:[#allocation4 + $0x6a4] ss:$16 sps:$4 sm:$0xff]  }
 0x18c   :  { %2653 = vmatpush1.bf16.msra.mxu1 %v3980_v31  ;;  %v738_v31 = vmul.f32 0.125, %v725_v27  ;;  %v4099_v27 = vld [vmem:[#allocation4 + $0x40c] ss:$16 sps:$4 sm:$0xff]  }
 0x18d   :  { %2571 = vmatpush1.bf16.msra.mxu0 %v3977_v26  ;;  %2654 = vmatprep.subr.bf16.mxu1 %v3988_v37  ;;  %v4040_v37 = vld [vmem:[#allocation4 + $0x2c8] ss:$16 sps:$4 sm:$0xff]  }
 0x18e   :  { %2572 = vmatprep.subr.bf16.mxu0 %v3985_v43  ;;  %v746_v26 = vadd.f32 1e-05, %v738_v31  ;;  %v4037_v43 = vld [vmem:[#allocation4 + $0x6c0] ss:$16 sps:$4 sm:$0xff]   ;;  %v4105_v31 = vld [vmem:[#allocation4 + $0x44c] ss:$16 sps:$4 sm:$0xff]  }
 0x190   :  { %2655 = vmatpush1.bf16.msra.mxu1 %v3986_v38  ;;  %v4048_v38 = vld [vmem:[#allocation4 + $0x2ec] ss:$16 sps:$4 sm:$0xff]   ;;  %4239 = vrsqrt.f32 %v746_v26  ;;  %v4109_v26 = vld [vmem:[#allocation4 + $0x488] ss:$16 sps:$4 sm:$0xff]  }
 0x191   :  { %2573 = vmatpush1.bf16.msra.mxu0 %v3983_v4  ;;  %2656 = vmatprep.subr.bf16.mxu1 %v3994_v44  ;;  %v4054_v4 = vld [vmem:[#allocation4 + $0x30c] ss:$16 sps:$4 sm:$0xff]   ;;  %v4051_v44 = vld [vmem:[#allocation4 + $0x704] ss:$16 sps:$4 sm:$0xff]  }
 0x192   :  { %2574 = vmatprep.subr.bf16.mxu0 %v3991_v46  ;;  %v4052_v46 = vld [vmem:[#allocation4 + $0x308] ss:$16 sps:$4 sm:$0xff]  }
 0x194   :  { %2657 = vmatpush1.bf16.msra.mxu1 %v3992_v47  ;;  %v784_v47 = vsub.s32 6, %v4403_v17 }
 0x195   :  { %2575 = vmatpush1.bf16.msra.mxu0 %v3989_v23  ;;  %2658 = vmatprep.subr.bf16.mxu1 %v4000_v22  ;;  %v4058_v23 = vld [vmem:[#allocation4 + $0x328] ss:$16 sps:$4 sm:$0xff]  }
 0x196   :  { %2576 = vmatprep.subr.bf16.mxu0 %v3997_v55  ;;  %v785_v22 = vrot.slane %v4413_v36, %v784_v47  ;;  %v4055_v55 = vld [vmem:[#allocation4 + $0x720] ss:$16 sps:$4 sm:$0xff]   ;;  %v875_v10 = vrot.slane %v4424_v53, %v784_v47  ;;  %v4127_v47 = vld [vmem:[#allocation4 + $0x548] ss:$16 sps:$4 sm:$0xff]  }
 0x197   :  { %v4085_v53 = vld [vmem:[#allocation4 + $0x7c0] ss:$16 sps:$4 sm:$0xff]  }
 0x198   :  { %2659 = vmatpush1.bf16.msra.mxu1 %v3998_v56  ;;  %v4066_v56 = vld [vmem:[#allocation4 + $0x34c] ss:$16 sps:$4 sm:$0xff]  }
 0x199   :  { %2577 = vmatpush1.bf16.msra.mxu0 %v3995_v58  ;;  %2669 = vmatprep.subr.bf16.mxu1 %v4006_v59  ;;  %v4064_v58 = vld [vmem:[#allocation4 + $0x348] ss:$16 sps:$4 sm:$0xff]   ;;  %v4061_v59 = vld [vmem:[#allocation4 + $0x740] ss:$16 sps:$4 sm:$0xff]  }
 0x19a   :  { %2587 = vmatprep.subr.bf16.mxu0 %v4003_v62  ;;  %v4240_v57 = vpop.eup %4239  ;;  %v4069_v62 = vld [vmem:[#allocation4 + $0x764] ss:$16 sps:$4 sm:$0xff]  }
 0x19b   :  { %2661 = vmatmul.mubr.bf16.vlgmr.msra.gmra.mrb[12].mxu1 %v4457_v52  ;;  %v4016_v52 = vld [vmem:[#allocation4 + $0x248] ss:$16 sps:$4 sm:$0xff]   ;;  %v804_v17 = vmul.f32 %v4240_v57, %v785_v22  ;;  %v4138_v22 = vld [vmem:[#allocation4 + $0x5ac] ss:$16 sps:$4 sm:$0xff]  }
 0x19c   :  { %2579 = vmatmul.mubr.bf16.vlgmr.msra.gmra.mrb[8].mxu0 %v4487_v1  ;;  %2670 = vmatpush1.bf16.msra.mxu1 %v4004_v63  ;;  %v4070_v63 = vld [vmem:[#allocation4 + $0x368] ss:$16 sps:$4 sm:$0xff]  }
 0x19d   :  { %2588 = vmatpush1.bf16.msra.mxu0 %v4001_v5  ;;  %2671 = vmatprep.subr.bf16.mxu1 %v4012_v6  ;;  %v833_v36 = vrot.slane %v804_v17, %v4408_v32  ;;  %v4075_v5 = vld [vmem:[#allocation4 + $0x784] ss:$16 sps:$4 sm:$0xff]   ;;  %v4076_v6 = vld [vmem:[#allocation4 + $0x388] ss:$16 sps:$4 sm:$0xff]   ;;  %v4147_v17 = vld [vmem:[#allocation4 + $0x60c] ss:$16 sps:$4 sm:$0xff]  }
 0x19e   :  { %2589 = vmatprep.subr.bf16.mxu0 %v4009_v7  ;;  %2701 = vmatprep.mubr.bf16.mxu1 %v4455_v50  ;;  %v4027_v50 = vld [vmem:[#allocation4 + $0x684] ss:$16 sps:$4 sm:$0xff]   ;;  %v4139_v57 = vld [vmem:[#allocation4 + $0x5c8] ss:$16 sps:$4 sm:$0xff]  }
 0x19f   :  { %2619 = vmatprep.mubr.bf16.mxu0 %v4490_v9  ;;  %v844_v7 = vmul.f32 %v833_v36, %v4481_v39  ;;  %v4151_v36 = vld [vmem:[#allocation4 + $0x648] ss:$16 sps:$4 sm:$0xff]  }
 0x1a0   :  { %2672 = vmatpush1.bf16.msra.mxu1 %v4010_v11  ;;  %v4073_v11 = vld [vmem:[#allocation4 + $0x780] ss:$16 sps:$4 sm:$0xff]  }
 0x1a1   :  { %2590 = vmatpush1.bf16.msra.mxu0 %v4007_v12  ;;  %2673 = vmatprep.subr.bf16.mxu1 %v4018_v14  ;;  %v4084_v12 = vld [vmem:[#allocation4 + $0x3ac] ss:$16 sps:$4 sm:$0xff]   ;;  %v4081_v14 = vld [vmem:[#allocation4 + $0x7a4] ss:$16 sps:$4 sm:$0xff]   ;;  %v894_v15 = vadd.f32 %v875_v10, %v844_v7 }
 0x1a2   :  { %2591 = vmatprep.subr.bf16.mxu0 %v4015_v16  ;;  %v4082_v16 = vld [vmem:[#allocation4 + $0x3a8] ss:$16 sps:$4 sm:$0xff]   ;;  %v4162_v7 = vld [vmem:[#allocation4 + $0x6ac] ss:$16 sps:$4 sm:$0xff]  }
 0x1a3   :  { %v910_v39 = vmul.f32 0.02, %v894_v15  ;;  %vm902_vm7 = vcmp.ge.f32.partialorder %v894_v15, 0.0  ;;  %v4165_v10 = vld [vmem:[#allocation4 + $0x6cc] ss:$16 sps:$4 sm:$0xff]  }
 0x1a4   :  { %2674 = vmatpush1.bf16.msra.mxu1 %v4016_v52  ;;  %v4079_v52 = vld [vmem:[#allocation4 + $0x7a0] ss:$16 sps:$4 sm:$0xff]  }
 0x1a5   :  { %2592 = vmatpush1.bf16.msra.mxu0 %v4013_v18  ;;  %2675 = vmatprep.subr.bf16.mxu1 %v4024_v13  ;;  %v4090_v18 = vld [vmem:[#allocation4 + $0x3cc] ss:$16 sps:$4 sm:$0xff]   ;;  %v4087_v13 = vld [vmem:[#allocation4 + $0x7c4] ss:$16 sps:$4 sm:$0xff]  }
 0x1a6   :  { %2593 = vmatprep.subr.bf16.mxu0 %v4021_v19  ;;  %v4088_v19 = vld [vmem:[#allocation4 + $0x3c8] ss:$16 sps:$4 sm:$0xff]  }
 0x1a8   :  { %2676 = vmatpush1.bf16.msra.mxu1 %v4022_v21  ;;  %v4093_v21 = vld [vmem:[#allocation4 + $0x7e4] ss:$16 sps:$4 sm:$0xff]  }
 0x1a9   :  { %2594 = vmatpush1.bf16.msra.mxu0 %v4019_v24  ;;  %2677 = vmatprep.subr.bf16.mxu1 %v4030_v25  ;;  %v4094_v24 = vld [vmem:[#allocation4 + $0x3e8] ss:$16 sps:$4 sm:$0xff]   ;;  %v4091_v25 = vld [vmem:[#allocation4 + $0x7e0] ss:$16 sps:$4 sm:$0xff]  }
 0x1aa   :  { %2595 = vmatprep.subr.bf16.mxu0 %v4027_v50  ;;  %v918_v50 = vsel %vm902_vm7, %v894_v15, %v910_v39  ;;  %v4168_v15 = vld [vmem:[#allocation4 + $0x6ec] ss:$16 sps:$4 sm:$0xff]   ;;  %v4172_v39 = vld [vmem:[#allocation4 + $0x728] ss:$16 sps:$4 sm:$0xff]  }
 0x1ac   :  { %2678 = vmatpush1.bf16.msra.mxu1 %v4028_v0  ;;  %v4500_v0 = vpack.c.bf16 %v918_v50, %v918_v50  ;;  %v4181_v50 = vld [vmem:[#allocation4 + $0x788] ss:$16 sps:$4 sm:$0xff]  }
 0x1ad   :  { %2596 = vmatpush1.bf16.msra.mxu0 %v4025_v28  ;;  %2679 = vmatprep.subr.bf16.mxu1 %v4036_v29  ;;  %v4097_v28 = vld [vmem:[#allocation4 + $0x408] ss:$16 sps:$4 sm:$0xff]   ;;  %v4102_v29 = vld [vmem:[#allocation4 + $0x42c] ss:$16 sps:$4 sm:$0xff]  }
 0x1ae   :  { %2597 = vmatprep.subr.bf16.mxu0 %v4033_v30  ;;  %v4100_v30 = vld [vmem:[#allocation4 + $0x428] ss:$16 sps:$4 sm:$0xff]  }
 0x1b0   :  { %2680 = vmatpush1.bf16.msra.mxu1 %v4034_v33  ;;  %v4103_v33 = vld [vmem:[#allocation4 + $0x448] ss:$16 sps:$4 sm:$0xff]  }
 0x1b1   :  { %2598 = vmatpush1.bf16.msra.mxu0 %v4031_v34  ;;  %2681 = vmatprep.subr.bf16.mxu1 %v4042_v42  ;;  %v4108_v34 = vld [vmem:[#allocation4 + $0x46c] ss:$16 sps:$4 sm:$0xff]   ;;  %v4106_v42 = vld [vmem:[#allocation4 + $0x468] ss:$16 sps:$4 sm:$0xff]  }
 0x1b2   :  { %2599 = vmatprep.subr.bf16.mxu0 %v4039_v35  ;;  %v4111_v35 = vld [vmem:[#allocation4 + $0x48c] ss:$16 sps:$4 sm:$0xff]  }
 0x1b4   :  { %2682 = vmatpush1.bf16.msra.mxu1 %v4040_v37  ;;  %v4112_v37 = vld [vmem:[#allocation4 + $0x4a8] ss:$16 sps:$4 sm:$0xff]  }
 0x1b5   :  { %2600 = vmatpush1.bf16.msra.mxu0 %v4037_v43  ;;  %2683 = vmatprep.subr.bf16.mxu1 %v4048_v38  ;;  %v4117_v43 = vld [vmem:[#allocation4 + $0x4cc] ss:$16 sps:$4 sm:$0xff]   ;;  %v4115_v38 = vld [vmem:[#allocation4 + $0x4c8] ss:$16 sps:$4 sm:$0xff]  }
 0x1b6   :  { %2601 = vmatprep.subr.bf16.mxu0 %v4045_v40  ;;  %v4118_v40 = vld [vmem:[#allocation4 + $0x4e8] ss:$16 sps:$4 sm:$0xff]  }
 0x1b8   :  { %2684 = vmatpush1.bf16.msra.mxu1 %v4046_v45  ;;  %v4123_v45 = vld [vmem:[#allocation4 + $0x50c] ss:$16 sps:$4 sm:$0xff]  }
 0x1b9   :  { %2602 = vmatpush1.bf16.msra.mxu0 %v4043_v41  ;;  %2685 = vmatprep.subr.bf16.mxu1 %v4054_v4  ;;  %v4121_v41 = vld [vmem:[#allocation4 + $0x508] ss:$16 sps:$4 sm:$0xff]   ;;  %v4126_v4 = vld [vmem:[#allocation4 + $0x52c] ss:$16 sps:$4 sm:$0xff]  }
 0x1ba   :  { %2603 = vmatprep.subr.bf16.mxu0 %v4051_v44  ;;  %v4124_v44 = vld [vmem:[#allocation4 + $0x528] ss:$16 sps:$4 sm:$0xff]  }
 0x1bc   :  { %2686 = vmatpush1.bf16.msra.mxu1 %v4052_v46  ;;  %v4129_v46 = vld [vmem:[#allocation4 + $0x54c] ss:$16 sps:$4 sm:$0xff]  }
 0x1bd   :  { %2604 = vmatpush1.bf16.msra.mxu0 %v4049_v49  ;;  %2687 = vmatprep.subr.bf16.mxu1 %v4060_v51  ;;  %v4132_v49 = vld [vmem:[#allocation4 + $0x56c] ss:$16 sps:$4 sm:$0xff]   ;;  %v4130_v51 = vld [vmem:[#allocation4 + $0x568] ss:$16 sps:$4 sm:$0xff]  }
 0x1be   :  { %2605 = vmatprep.subr.bf16.mxu0 %v4057_v54  ;;  %v4135_v54 = vld [vmem:[#allocation4 + $0x58c] ss:$16 sps:$4 sm:$0xff]  }
 0x1c0   :  { %2688 = vmatpush1.bf16.msra.mxu1 %v4058_v23  ;;  %v4133_v23 = vld [vmem:[#allocation4 + $0x588] ss:$16 sps:$4 sm:$0xff]  }
 0x1c1   :  { %2606 = vmatpush1.bf16.msra.mxu0 %v4055_v55  ;;  %2689 = vmatprep.subr.bf16.mxu1 %v4066_v56  ;;  %v4136_v55 = vld [vmem:[#allocation4 + $0x5a8] ss:$16 sps:$4 sm:$0xff]   ;;  %v4141_v56 = vld [vmem:[#allocation4 + $0x5cc] ss:$16 sps:$4 sm:$0xff]  }
 0x1c2   :  { %2607 = vmatprep.subr.bf16.mxu0 %v4063_v8  ;;  %v4144_v8 = vld [vmem:[#allocation4 + $0x5ec] ss:$16 sps:$4 sm:$0xff]  }
 0x1c4   :  { %2690 = vmatpush1.bf16.msra.mxu1 %v4064_v58  ;;  %v4142_v58 = vld [vmem:[#allocation4 + $0x5e8] ss:$16 sps:$4 sm:$0xff]  }
 0x1c5   :  { %2608 = vmatpush1.bf16.msra.mxu0 %v4061_v59  ;;  %2691 = vmatprep.subr.bf16.mxu1 %v4072_v61  ;;  %v4145_v59 = vld [vmem:[#allocation4 + $0x608] ss:$16 sps:$4 sm:$0xff]   ;;  %v4150_v61 = vld [vmem:[#allocation4 + $0x62c] ss:$16 sps:$4 sm:$0xff]  }
 0x1c6   :  { %2609 = vmatprep.subr.bf16.mxu0 %v4069_v62  ;;  %v4148_v62 = vld [vmem:[#allocation4 + $0x628] ss:$16 sps:$4 sm:$0xff]  }
 0x1c8   :  { %2692 = vmatpush1.bf16.msra.mxu1 %v4070_v63  ;;  %v4153_v63 = vld [vmem:[#allocation4 + $0x64c] ss:$16 sps:$4 sm:$0xff]  }
 0x1c9   :  { %2610 = vmatpush1.bf16.msra.mxu0 %v4067_v2  ;;  %2693 = vmatprep.subr.bf16.mxu1 %v4078_v3  ;;  %v4156_v2 = vld [vmem:[#allocation4 + $0x66c] ss:$16 sps:$4 sm:$0xff]   ;;  %v4154_v3 = vld [vmem:[#allocation4 + $0x668] ss:$16 sps:$4 sm:$0xff]  }
 0x1ca   :  { %2611 = vmatprep.subr.bf16.mxu0 %v4075_v5  ;;  %v4159_v5 = vld [vmem:[#allocation4 + $0x68c] ss:$16 sps:$4 sm:$0xff]  }
 0x1cc   :  { %2694 = vmatpush1.bf16.msra.mxu1 %v4076_v6  ;;  %v4157_v6 = vld [vmem:[#allocation4 + $0x688] ss:$16 sps:$4 sm:$0xff]  }
 0x1cd   :  { %2612 = vmatpush1.bf16.msra.mxu0 %v4073_v11  ;;  %2695 = vmatprep.subr.bf16.mxu1 %v4084_v12 }
 0x1ce   :  { %2613 = vmatprep.subr.bf16.mxu0 %v4081_v14  ;;  %v4163_v14 = vld [vmem:[#allocation4 + $0x6c8] ss:$16 sps:$4 sm:$0xff]  }
 0x1d0   :  { %2696 = vmatpush1.bf16.msra.mxu1 %v4082_v16 }
 0x1d1   :  { %2614 = vmatpush1.bf16.msra.mxu0 %v4079_v52  ;;  %2697 = vmatprep.subr.bf16.mxu1 %v4090_v18  ;;  %v4166_v52 = vld [vmem:[#allocation4 + $0x6e8] ss:$16 sps:$4 sm:$0xff]   ;;  %v4171_v18 = vld [vmem:[#allocation4 + $0x70c] ss:$16 sps:$4 sm:$0xff]  }
 0x1d2   :  { %2615 = vmatprep.subr.bf16.mxu0 %v4087_v13  ;;  %v4169_v13 = vld [vmem:[#allocation4 + $0x708] ss:$16 sps:$4 sm:$0xff]  }
 0x1d4   :  { %2698 = vmatpush1.bf16.msra.mxu1 %v4088_v19  ;;  %v4174_v19 = vld [vmem:[#allocation4 + $0x72c] ss:$16 sps:$4 sm:$0xff]  }
 0x1d5   :  { %2616 = vmatpush1.bf16.msra.mxu0 %v4085_v53  ;;  %2699 = vmatprep.subr.bf16.mxu1 %v4096_v20  ;;  %v4177_v53 = vld [vmem:[#allocation4 + $0x74c] ss:$16 sps:$4 sm:$0xff]   ;;  %v4175_v20 = vld [vmem:[#allocation4 + $0x748] ss:$16 sps:$4 sm:$0xff]  }
 0x1d6   :  { %2617 = vmatprep.subr.bf16.mxu0 %v4093_v21  ;;  %v4180_v21 = vld [vmem:[#allocation4 + $0x76c] ss:$16 sps:$4 sm:$0xff]  }
 0x1d8   :  { %2700 = vmatpush1.bf16.msra.mxu1 %v4094_v24  ;;  %v4178_v24 = vld [vmem:[#allocation4 + $0x768] ss:$16 sps:$4 sm:$0xff]  }
 0x1d9   :  { %2618 = vmatpush1.bf16.msra.mxu0 %v4091_v25  ;;  %2710 = vmatprep.subr.bf16.mxu1 %v4099_v27  ;;  %v4183_v25 = vld [vmem:[#allocation4 + $0x78c] ss:$16 sps:$4 sm:$0xff]  }
 0x1da   :  { %v4186_v27 = vld [vmem:[#allocation4 + $0x7ac] ss:$16 sps:$4 sm:$0xff]  }
 0x1db   :  { %2702 = vmatmul.mubr.bf16.vlgmr.msra.gmra.mrb[12].mxu1 %v4453_v48  ;;  %v4114_v48 = vld [vmem:[#allocation4 + $0x4ac] ss:$16 sps:$4 sm:$0xff]  }
 0x1dc   :  { %2620 = vmatmul.mubr.bf16.vlgmr.msra.gmra.mrb[8].mxu0 %v4500_v0  ;;  %2711 = vmatpush1.bf16.msra.mxu1 %v4097_v28  ;;  %v4184_v28 = vld [vmem:[#allocation4 + $0x7a8] ss:$16 sps:$4 sm:$0xff]  }
 0x1dd   :  { %2712 = vmatprep.subr.bf16.mxu1 %v4102_v29  ;;  %2742 = vmatprep.mubr.bf16.mxu1 %v4469_v60  ;;  %v4120_v60 = vld [vmem:[#allocation4 + $0x4ec] ss:$16 sps:$4 sm:$0xff]  }
 0x1de   :  { %v4189_v29 = vld [vmem:[#allocation4 + $0x7cc] ss:$16 sps:$4 sm:$0xff]  }
 0x1e0   :  { %2713 = vmatpush1.bf16.msra.mxu1 %v4100_v30  ;;  %v4187_v30 = vld [vmem:[#allocation4 + $0x7c8] ss:$16 sps:$4 sm:$0xff]  }
 0x1e1   :  { %2714 = vmatprep.subr.bf16.mxu1 %v4105_v31  ;;  %v4192_v31 = vld [vmem:[#allocation4 + $0x7ec] ss:$16 sps:$4 sm:$0xff]  }
 0x1e4   :  { %2715 = vmatpush1.bf16.msra.mxu1 %v4103_v33  ;;  %v4190_v33 = vld [vmem:[#allocation4 + $0x7e8] ss:$16 sps:$4 sm:$0xff]  }
 0x1e5   :  { %2716 = vmatprep.subr.bf16.mxu1 %v4108_v34 }
 0x1e8   :  { %2717 = vmatpush1.bf16.msra.mxu1 %v4106_v42 }
 0x1e9   :  { %2718 = vmatprep.subr.bf16.mxu1 %v4111_v35 }
 0x1ec   :  { %2719 = vmatpush1.bf16.msra.mxu1 %v4109_v26 }
 0x1ed   :  { %2720 = vmatprep.subr.bf16.mxu1 %v4114_v48 }
 0x1f0   :  { %2721 = vmatpush1.bf16.msra.mxu1 %v4112_v37 }
 0x1f1   :  { %2722 = vmatprep.subr.bf16.mxu1 %v4117_v43 }
 0x1f4   :  { %2723 = vmatpush1.bf16.msra.mxu1 %v4115_v38  ;;  %v4193_v38 = vld [vmem:[%s4674_s7] sm:$0xff]  }
 0x1f5   :  { %2724 = vmatprep.subr.bf16.mxu1 %v4120_v60  ;;  %v4298_v60 = vmov 0.0  }
 0x1f6   :  { %3685 = vmatprep.subr.bf16.mxu0 %v4298_v60  ;;  %3701 = vmatprep.mubr.msk.bf16.mxu0 %vm4299_vm8, %v4298_v60 }
 0x1f7   :  { %3686 = vmatpush3.bf16.msra.mxu0 %v4193_v38 }
 0x1f8   :  { %2725 = vmatpush1.bf16.msra.mxu1 %v4118_v40  ;;  %3687 = vmatprep.subr.bf16.mxu0 %v4298_v60  ;;  %v4195_v40 = vld [vmem:[%s4674_s7 + $0x10] sm:$0xff]  }
 0x1f9   :  { %2726 = vmatprep.subr.bf16.mxu1 %v4123_v45  ;;  %v4196_v45 = vld [vmem:[%s4674_s7 + $0x18] sm:$0xff]  }
 0x1fc   :  { %2727 = vmatpush1.bf16.msra.mxu1 %v4121_v41  ;;  %v4197_v41 = vld [vmem:[%s4674_s7 + $0x20] sm:$0xff]  }
 0x1fd   :  { %2728 = vmatprep.subr.bf16.mxu1 %v4126_v4  ;;  %v4198_v4 = vld [vmem:[%s4674_s7 + $0x28] sm:$0xff]  }
 0x200   :  { %2729 = vmatpush1.bf16.msra.mxu1 %v4124_v44  ;;  %v4199_v44 = vld [vmem:[%s4674_s7 + $0x30] sm:$0xff]  }
 0x201   :  { %2730 = vmatprep.subr.bf16.mxu1 %v4129_v46  ;;  %v4200_v46 = vld [vmem:[%s4674_s7 + $0x38] sm:$0xff]  }
 0x204   :  { %2731 = vmatpush1.bf16.msra.mxu1 %v4127_v47 }
 0x205   :  { %2732 = vmatprep.subr.bf16.mxu1 %v4132_v49 }
 0x208   :  { %2733 = vmatpush1.bf16.msra.mxu1 %v4130_v51 }
 0x209   :  { %2734 = vmatprep.subr.bf16.mxu1 %v4135_v54 }
 0x20c   :  { %2735 = vmatpush1.bf16.msra.mxu1 %v4133_v23 }
 0x20d   :  { %2736 = vmatprep.subr.bf16.mxu1 %v4138_v22 }
 0x210   :  { %2737 = vmatpush1.bf16.msra.mxu1 %v4136_v55 }
 0x211   :  { %2738 = vmatprep.subr.bf16.mxu1 %v4141_v56 }
 0x214   :  { %2739 = vmatpush1.bf16.msra.mxu1 %v4139_v57 }
 0x215   :  { %2740 = vmatprep.subr.bf16.mxu1 %v4144_v8 }
 0x218   :  { %2741 = vmatpush1.bf16.msra.mxu1 %v4142_v58 }
 0x219   :  { %2751 = vmatprep.subr.bf16.mxu1 %v4147_v17 }
 0x21b   :  { %2743 = vmatmul.mubr.bf16.vlgmr.msra.gmra.mrb[12].mxu1 %v4487_v1  ;;  %v4160_v1 = vld [vmem:[#allocation4 + $0x6a8] ss:$16 sps:$4 sm:$0xff]  }
 0x21c   :  { %2752 = vmatpush1.bf16.msra.mxu1 %v4145_v59  ;;  %2783 = vmatprep.mubr.bf16.mxu1 %v4490_v9 }
 0x21d   :  { %2753 = vmatprep.subr.bf16.mxu1 %v4150_v61 }
 0x220   :  { %2754 = vmatpush1.bf16.msra.mxu1 %v4148_v62 }
 0x221   :  { %2755 = vmatprep.subr.bf16.mxu1 %v4153_v63 }
 0x224   :  { %2756 = vmatpush1.bf16.msra.mxu1 %v4151_v36 }
 0x225   :  { %2757 = vmatprep.subr.bf16.mxu1 %v4156_v2 }
 0x228   :  { %2758 = vmatpush1.bf16.msra.mxu1 %v4154_v3 }
 0x229   :  { %2759 = vmatprep.subr.bf16.mxu1 %v4159_v5 }
 0x22c   :  { %2760 = vmatpush1.bf16.msra.mxu1 %v4157_v6 }
 0x22d   :  { %2761 = vmatprep.subr.bf16.mxu1 %v4162_v7 }
 0x22e   :  { %v2498_v9 = vpop.f32.mrb[8].mxu1 }
 0x22f   :  { %v2500_v11 = vpop.f32.mrb[9].mxu1 }
 0x230   :  { %2762 = vmatpush1.bf16.msra.mxu1 %v4160_v1  ;;  %v2502_v12 = vpop.f32.mrb[10].mxu1 }
 0x231   :  { %v2503_v16 = vpop.f32.mrb[11].mxu1  ;;  %2763 = vmatprep.subr.bf16.mxu1 %v4165_v10 }
 0x234   :  { %2764 = vmatpush1.bf16.msra.mxu1 %v4163_v14 }
 0x235   :  { %2765 = vmatprep.subr.bf16.mxu1 %v4168_v15 }
 0x238   :  { %2766 = vmatpush1.bf16.msra.mxu1 %v4166_v52 }
 0x239   :  { %2767 = vmatprep.subr.bf16.mxu1 %v4171_v18 }
 0x23c   :  { %2768 = vmatpush1.bf16.msra.mxu1 %v4169_v13  ;;  %v2822_v13 = vld [vmem:[%s4672_s5] sm:$0x1] }
 0x23d   :  { %2769 = vmatprep.subr.bf16.mxu1 %v4174_v19 }
 0x240   :  { %2770 = vmatpush1.bf16.msra.mxu1 %v4172_v39 }
 0x241   :  { %2771 = vmatprep.subr.bf16.mxu1 %v4177_v53 }
 0x244   :  { %2772 = vmatpush1.bf16.msra.mxu1 %v4175_v20  ;;  %v3615_v20 = vld [vmem:[%s4673_s6] ss:$0 sm:$0xff] }
 0x245   :  { %2773 = vmatprep.subr.bf16.mxu1 %v4180_v21 }
 0x248   :  { %2774 = vmatpush1.bf16.msra.mxu1 %v4178_v24 }
 0x249   :  { %2775 = vmatprep.subr.bf16.mxu1 %v4183_v25 }
 0x24c   :  { %2776 = vmatpush1.bf16.msra.mxu1 %v4181_v50 }
 0x24d   :  { %2777 = vmatprep.subr.bf16.mxu1 %v4186_v27 }
 0x250   :  { %2778 = vmatpush1.bf16.msra.mxu1 %v4184_v28 }
 0x251   :  { %2779 = vmatprep.subr.bf16.mxu1 %v4189_v29 }
 0x254   :  { %2780 = vmatpush1.bf16.msra.mxu1 %v4187_v30 }
 0x255   :  { %2781 = vmatprep.subr.bf16.mxu1 %v4192_v31 }
 0x258   :  { %2782 = vmatpush1.bf16.msra.mxu1 %v4190_v33 }
 0x25b   :  { %2784 = vmatmul.mubr.bf16.vlgmr.msra.gmra.mrb[12].mxu1 %v4500_v0  ;;  %v4194_v0 = vld [vmem:[%s4674_s7 + $0x8] sm:$0xff]  }
 0x25c   :  { %3688 = vmatpush3.bf16.msra.mxu0 %v4194_v0  ;;  %v4208_v0 = vld [vmem:[%s4674_s7 + $0x78] sm:$0xff]  }
 0x25d   :  { %3689 = vmatprep.subr.bf16.mxu0 %v4298_v60 }
 0x260   :  { %3690 = vmatpush3.bf16.msra.mxu0 %v4195_v40 }
 0x261   :  { %3691 = vmatprep.subr.bf16.mxu0 %v4298_v60 }
 0x264   :  { %3692 = vmatpush3.bf16.msra.mxu0 %v4196_v45  ;;  %v4209_v45 = vld [vmem:[%s4674_s7 + $0x80] sm:$0xff]  }
 0x265   :  { %3693 = vmatprep.subr.bf16.mxu0 %v4298_v60 }
 0x268   :  { %3694 = vmatpush3.bf16.msra.mxu0 %v4197_v41 }
 0x269   :  { %3695 = vmatprep.subr.bf16.mxu0 %v4298_v60 }
 0x26c   :  { %3696 = vmatpush3.bf16.msra.mxu0 %v4198_v4  ;;  %v4210_v4 = vld [vmem:[%s4674_s7 + $0x88] sm:$0xff]  }
 0x26d   :  { %3697 = vmatprep.subr.bf16.mxu0 %v4298_v60 }
 0x270   :  { %3698 = vmatpush3.bf16.msra.mxu0 %v4199_v44  ;;  %v4211_v44 = vld [vmem:[%s4674_s7 + $0x90] sm:$0xff]  }
 0x271   :  { %3699 = vmatprep.subr.bf16.mxu0 %v4298_v60 }
 0x274   :  { %3700 = vmatpush3.bf16.msra.mxu0 %v4200_v46  ;;  %v4212_v46 = vld [vmem:[%s4674_s7 + $0x98] sm:$0xff]  }
 0x275   :  { %3705 = vmatprep.subr.bf16.mxu0 %v4298_v60 }
 0x2af   :  { %v2621_v34 = vpop.f32.mrb[8].mxu0 }
 0x2b0   :  { %v3765_v42 = vadd.f32 %v2621_v34, %v2498_v9  ;;  %v2623_v35 = vpop.f32.mrb[9].mxu0  ;;  %v4202_v34 = vld [vmem:[%s4674_s7 + $0x48] sm:$0xff]  }
 0x2b1   :  { %v3766_v26 = vadd.f32 %v2623_v35, %v2500_v11  ;;  %v2625_v48 = vpop.f32.mrb[10].mxu0  ;;  %v4204_v35 = vld [vmem:[%s4674_s7 + $0x58] sm:$0xff]  }
 0x2b2   :  { %v2626_v37 = vpop.f32.mrb[11].mxu0  ;;  %v4206_v48 = vld [vmem:[%s4674_s7 + $0x68] sm:$0xff]  }
 0x2b3   :  { %v2792_v43 = vadd.f32 %v3766_v26, %v3765_v42 }
 0x32e   :  { %v2785_v47 = vpop.f32.mrb[12].mxu1 }
 0x32f   :  { %v2793_v49 = vadd.f32 %v2792_v43, %v2785_v47  ;;  %v2787_v51 = vpop.f32.mrb[13].mxu1  ;;  %v4207_v43 = vld [vmem:[%s4674_s7 + $0x70] sm:$0xff]  }
 0x330   :  { %v2789_v54 = vpop.f32.mrb[14].mxu1 }
 0x331   :  { %v2794_v23 = vadd.f32 %v2793_v49, %v2787_v51  ;;  %v2790_v22 = vpop.f32.mrb[15].mxu1  ;;  %v4214_v49 = vld [vmem:[%s4674_s7 + $0xa8] sm:$0xff]  }
 0x333   :  { %v2795_v55 = vrot.slane %v2794_v23, 4 }
 0x335   :  { %v2796_v56 = vadd.f32 %v2795_v55, %v2794_v23  ;;  %v4216_v23 = vld [vmem:[%s4674_s7 + $0xb8] sm:$0xff]   ;;  %v4217_v55 = vld [vmem:[%s4674_s7 + $0xc0] sm:$0xff]  }
 0x337   :  { %v2797_v57 = vrot.slane %v2796_v56, 2 }
 0x339   :  { %v2798_v8 = vadd.f32 %v2797_v57, %v2796_v56  ;;  %v4218_v57 = vld [vmem:[%s4674_s7 + $0xc8] sm:$0xff]  }
 0x33b   :  { %v2799_v58 = vrot.slane %v2798_v8, 1 }
 0x33d   :  { %v2800_v17 = vadd.f32 %v2799_v58, %v2798_v8  ;;  %v4219_v8 = vld [vmem:[%s4674_s7 + $0xd0] sm:$0xff]   ;;  %v4220_v58 = vld [vmem:[%s4674_s7 + $0xd8] sm:$0xff]  }
 0x33f   :  { %v2801_v59 = vmul.f32 0.03125, %v2800_v17  ;;  %v4221_v17 = vld [vmem:[%s4674_s7 + $0xe0] sm:$0xff]  }
 0x341   :  { %v2802_v61 = vsub.f32 %v3765_v42, %v2801_v59  ;;  %v2803_v62 = vsub.f32 %v3766_v26, %v2801_v59  ;;  %v2804_v63 = vsub.f32 %v2785_v47, %v2801_v59  ;;  %v2805_v36 = vsub.f32 %v2787_v51, %v2801_v59  ;;  %v4203_v42 = vld [vmem:[%s4674_s7 + $0x50] sm:$0xff]   ;;  %v4205_v26 = vld [vmem:[%s4674_s7 + $0x60] sm:$0xff]   ;;  %v4222_v59 = vld [vmem:[%s4674_s7 + $0xe8] sm:$0xff]  }
 0x342   :  { %v4213_v47 = vld [vmem:[%s4674_s7 + $0xa0] sm:$0xff]   ;;  %v4215_v51 = vld [vmem:[%s4674_s7 + $0xb0] sm:$0xff]  }
 0x343   :  { %v2806_v2 = vmul.f32 %v2802_v61, %v2802_v61  ;;  %v2807_v3 = vmul.f32 %v2803_v62, %v2803_v62  ;;  %v2809_v6 = vmul.f32 %v2804_v63, %v2804_v63  ;;  %v2811_v1 = vmul.f32 %v2805_v36, %v2805_v36 }
 0x345   :  { %v2808_v5 = vadd.f32 %v2807_v3, %v2806_v2  ;;  %v3624_v3 = vld [vmem:[%s4675_s8] ss:$0 sm:$0xff] }
 0x347   :  { %v2810_v7 = vadd.f32 %v2809_v6, %v2808_v5 }
 0x349   :  { %v2812_v10 = vadd.f32 %v2811_v1, %v2810_v7 }
 0x34b   :  { %v2813_v9 = vrot.slane %v2812_v10, 4 }
 0x34d   :  { %v2814_v11 = vadd.f32 %v2813_v9, %v2812_v10 }
 0x34f   :  { %v2815_v12 = vrot.slane %v2814_v11, 2 }
 0x351   :  { %v2816_v14 = vadd.f32 %v2815_v12, %v2814_v11 }
 0x353   :  { %v2817_v16 = vrot.slane %v2816_v14, 1 }
 0x355   :  { %v2818_v15 = vadd.f32 %v2817_v16, %v2816_v14 }
 0x357   :  { %v2819_v52 = vmul.f32 0.03125, %v2818_v15 }
 0x359   :  { %v2820_v18 = vadd.f32 1e-05, %v2819_v52 }
 0x35b   :  { %4241 = vrsqrt.f32 %v2820_v18 }
 0x365   :  { %v4242_v19 = vpop.eup %4241 }
 0x366   :  { %v2823_v39 = vmul.f32 %v4242_v19, %v2822_v13 }
 0x368   :  { %v2828_v53 = vrot.slane %v2823_v39, %v4408_v32  ;;  %v4201_v32 = vld [vmem:[%s4674_s7 + $0x40] sm:$0xff]  }
 0x36a   :  { %v3064_v21 = vmul.f32 %v2828_v53, %v2804_v63  ;;  %v3175_v24 = vmul.f32 %v2828_v53, %v2805_v36  ;;  %v2829_v25 = vmul.f32 %v2828_v53, %v2802_v61  ;;  %v2953_v50 = vmul.f32 %v2828_v53, %v2803_v62  ;;  %v4223_v61 = vld [vmem:[%s4674_s7 + $0xf0] sm:$0xff]   ;;  %v4224_v63 = vld [vmem:[%s4674_s7 + $0xf8] sm:$0xff]  }
 0x36c   :  { %v4550_v27 = vadd.f32 %v3615_v20, %v3175_v24  ;;  %v2837_v28 = vadd.f32 %v3615_v20, %v2829_v25  ;;  %v4552_v29 = vadd.f32 %v3615_v20, %v3064_v21  ;;  %v2954_v37 = vadd.f32 %v3615_v20, %v2953_v50 }
 0x36e   :  { %vm2838_vm9 = vcmp.ge.f32.partialorder %v2837_v28, 0.0  ;;  %v2839_v30 = vmul.f32 0.02, %v2837_v28  ;;  %v2956_v38 = vmul.f32 0.02, %v2954_v37  ;;  %vm2955_vm10 = vcmp.ge.f32.partialorder %v2954_v37, 0.0 }
 0x36f   :  { %v3067_v54 = vmul.f32 0.02, %v4552_v29  ;;  %vm3066_vm11 = vcmp.ge.f32.partialorder %v4552_v29, 0.0  ;;  %v3178_v62 = vmul.f32 0.02, %v4550_v27  ;;  %vm3177_vm12 = vcmp.ge.f32.partialorder %v4550_v27, 0.0 }
 0x370   :  { %v2840_v31 = vsel %vm2838_vm9, %v2837_v28, %v2839_v30  ;;  %v2957_v40 = vsel %vm2955_vm10, %v2954_v37, %v2956_v38 }
 0x371   :  { %v2841_v33 = vpack.c.bf16 %v2840_v31, %v2840_v31  ;;  %v2958_v41 = vpack.c.bf16 %v2957_v40, %v2957_v40  ;;  %v3068_v22 = vsel %vm3066_vm11, %v4552_v29, %v3067_v54  ;;  %v3179_v36 = vsel %vm3177_vm12, %v4550_v27, %v3178_v62 }
 0x372   :  { %v3069_v56 = vpack.c.bf16 %v3068_v22, %v3068_v22  ;;  %v3180_v2 = vpack.c.bf16 %v3179_v36, %v3179_v36 }
 0x373   :  { %3702 = vmatmul.mubr.bf16.vlgmr.msra.gmra.mrb[12].mxu0 %v2841_v33 }
 0x374   :  { %3706 = vmatpush3.bf16.msra.mxu0 %v4201_v32  ;;  %3721 = vmatprep.mubr.msk.bf16.mxu0 %vm4299_vm8, %v4298_v60 }
 0x375   :  { %3707 = vmatprep.subr.bf16.mxu0 %v4298_v60 }
 0x378   :  { %3708 = vmatpush3.bf16.msra.mxu0 %v4202_v34 }
 0x379   :  { %3709 = vmatprep.subr.bf16.mxu0 %v4298_v60 }
 0x37c   :  { %3710 = vmatpush3.bf16.msra.mxu0 %v4203_v42 }
 0x37d   :  { %3711 = vmatprep.subr.bf16.mxu0 %v4298_v60 }
 0x380   :  { %3712 = vmatpush3.bf16.msra.mxu0 %v4204_v35 }
 0x381   :  { %3713 = vmatprep.subr.bf16.mxu0 %v4298_v60 }
 0x384   :  { %3714 = vmatpush3.bf16.msra.mxu0 %v4205_v26 }
 0x385   :  { %3715 = vmatprep.subr.bf16.mxu0 %v4298_v60 }
 0x388   :  { %3716 = vmatpush3.bf16.msra.mxu0 %v4206_v48 }
 0x389   :  { %3717 = vmatprep.subr.bf16.mxu0 %v4298_v60 }
 0x38c   :  { %3718 = vmatpush3.bf16.msra.mxu0 %v4207_v43 }
 0x38d   :  { %3719 = vmatprep.subr.bf16.mxu0 %v4298_v60 }
 0x390   :  { %3720 = vmatpush3.bf16.msra.mxu0 %v4208_v0 }
 0x391   :  { %3725 = vmatprep.subr.bf16.mxu0 %v4298_v60 }
 0x393   :  { %3722 = vmatmul.mubr.bf16.vlgmr.msra.gmra.mrb[12].mxu0 %v2958_v41 }
 0x394   :  { %3726 = vmatpush3.bf16.msra.mxu0 %v4209_v45  ;;  %3741 = vmatprep.mubr.msk.bf16.mxu0 %vm4299_vm8, %v4298_v60 }
 0x395   :  { %3727 = vmatprep.subr.bf16.mxu0 %v4298_v60 }
 0x398   :  { %3728 = vmatpush3.bf16.msra.mxu0 %v4210_v4 }
 0x399   :  { %3729 = vmatprep.subr.bf16.mxu0 %v4298_v60 }
 0x39c   :  { %3730 = vmatpush3.bf16.msra.mxu0 %v4211_v44 }
 0x39d   :  { %3731 = vmatprep.subr.bf16.mxu0 %v4298_v60 }
 0x3a0   :  { %3732 = vmatpush3.bf16.msra.mxu0 %v4212_v46 }
 0x3a1   :  { %3733 = vmatprep.subr.bf16.mxu0 %v4298_v60 }
 0x3a4   :  { %3734 = vmatpush3.bf16.msra.mxu0 %v4213_v47 }
 0x3a5   :  { %3735 = vmatprep.subr.bf16.mxu0 %v4298_v60 }
 0x3a8   :  { %3736 = vmatpush3.bf16.msra.mxu0 %v4214_v49 }
 0x3a9   :  { %3737 = vmatprep.subr.bf16.mxu0 %v4298_v60 }
 0x3ac   :  { %3738 = vmatpush3.bf16.msra.mxu0 %v4215_v51 }
 0x3ad   :  { %3739 = vmatprep.subr.bf16.mxu0 %v4298_v60 }
 0x3b0   :  { %3740 = vmatpush3.bf16.msra.mxu0 %v4216_v23 }
 0x3b1   :  { %3745 = vmatprep.subr.bf16.mxu0 %v4298_v60 }
 0x3b3   :  { %3742 = vmatmul.mubr.bf16.vlgmr.msra.gmra.mrb[12].mxu0 %v3069_v56 }
 0x3b4   :  { %3746 = vmatpush3.bf16.msra.mxu0 %v4217_v55  ;;  %3761 = vmatprep.mubr.msk.bf16.mxu0 %vm4299_vm8, %v4298_v60 }
 0x3b5   :  { %3747 = vmatprep.subr.bf16.mxu0 %v4298_v60 }
 0x3b8   :  { %3748 = vmatpush3.bf16.msra.mxu0 %v4218_v57 }
 0x3b9   :  { %3749 = vmatprep.subr.bf16.mxu0 %v4298_v60 }
 0x3bc   :  { %3750 = vmatpush3.bf16.msra.mxu0 %v4219_v8 }
 0x3bd   :  { %3751 = vmatprep.subr.bf16.mxu0 %v4298_v60 }
 0x3c0   :  { %3752 = vmatpush3.bf16.msra.mxu0 %v4220_v58 }
 0x3c1   :  { %3753 = vmatprep.subr.bf16.mxu0 %v4298_v60 }
 0x3c4   :  { %3754 = vmatpush3.bf16.msra.mxu0 %v4221_v17 }
 0x3c5   :  { %3755 = vmatprep.subr.bf16.mxu0 %v4298_v60 }
 0x3c8   :  { %3756 = vmatpush3.bf16.msra.mxu0 %v4222_v59 }
 0x3c9   :  { %3757 = vmatprep.subr.bf16.mxu0 %v4298_v60 }
 0x3cc   :  { %3758 = vmatpush3.bf16.msra.mxu0 %v4223_v61 }
 0x3cd   :  { %3759 = vmatprep.subr.bf16.mxu0 %v4298_v60 }
 0x3d0   :  { %3760 = vmatpush3.bf16.msra.mxu0 %v4224_v63 }
 0x3d3   :  { %3762 = vmatmul.mubr.bf16.vlgmr.msra.gmra.mrb[12].mxu0 %v3180_v2 }
 0x4a6   :  { %v3279_v5 = vpop.f32.mrb[12].mxu0 }
 0x4a7   :  { %v3767_v6 = vadd.f32 %v3624_v3, %v3279_v5  ;;  %v3763_v7 = vpop.f32.mrb[13].mxu0 }
 0x4a8   :  { %v3282_v1 = vpop.f32.mrb[14].mxu0 }
 0x4a9   :  { %v3286_v10 = vmax.f32 %v3767_v6, 0.0  ;;  %v3764_v9 = vpop.f32.mrb[15].mxu0 }
 0x4ab   :  { %3288 = vst.msk [vmem:[%s4676_s9] sm:$0xff] %vm3287_vm13, %v3286_v10 }
 0x4ac   :  { %3293 = vsyncpa [#allocation3], 1 }
 0x4ad   :  { %3294 = vsyncpa [#allocation5], 1 }

</bundles_post_ra>
